<compile_context>
chip_gen: v6e
topology: v6e:2x2x1
jax: 0.10.0
libtpu: 0.0.40
codegen_flags: <defaults>
</compile_context>

<pallas_src>
import functools

import jax
import jax.numpy as jnp
from jax.experimental import pallas as pl
from jax.experimental.pallas import tpu as pltpu

_EPS = 1e-10
_LANE = 128


def _round_up(x, m):
    return (x + m - 1) // m * m


def _choose_tile_b(B, requested=256):
    """Batch rows per grid step: big tiles amortize per-step pipeline overhead,
    but keep >=4 grid steps (>=2 per v7x TensorCore) once B is large enough."""
    target = max(8, _round_up((B + 3) // 4, 8))
    return max(8, min(_round_up(requested, 8), target))


def _dev_model_kernel(qe_ref, mask_ref, pu_ref, w1_ref, wbig_ref, a1p_ref,
                      wa_ref, vec_ref, o_ref):
    tb, L = mask_ref.shape
    D = pu_ref.shape[1]
    n_out = o_ref.shape[1]

    vec = vec_ref[...]                 # packed small constants (f32)
    b1 = vec[0:1, :D]                  # g_v layer-1 bias
    bias_big = vec[1:2, :2 * D]        # [b2 | b2 @ A1x + ab1]
    a2 = vec[2:3, :D]                  # attention Linear(D, 1) weight row
    ba = vec[3:4, :n_out]              # final bias (lane-padded)

    mask = mask_ref[...]               # (tb, L), 1.0 where item id > 0

    # g_v layer 1: tanh(cat([q_a, e_r]) @ W1 + b1); the concat is folded in the
    # wrapper so this is a single K=2D contraction over tb*L rows.
    h1 = jnp.tanh(
        jnp.dot(qe_ref[...], w1_ref[...], preferred_element_type=jnp.float32) + b1)

    # Fused g_v layer 2 + attention layer 1 (x_ia path): one wider-N MXU pass
    # producing [x_ia | x_ia @ A1x] (x_a1 no longer waits on x_ia popping).
    big = jnp.dot(h1.astype(wbig_ref.dtype), wbig_ref[...],
                  preferred_element_type=jnp.float32) + bias_big        # (tb*L, 2D)
    x_ia = big[:, :D].reshape(tb, L, D)
    x_att = big[:, D:].reshape(tb, L, D)

    # p_i = mask * p_u contribution: one (tb, D) matmul broadcast over items.
    pu_a1 = jnp.dot(pu_ref[...], a1p_ref[...], preferred_element_type=jnp.float32)
    h_att = jnp.maximum(x_att + mask[:, :, None] * pu_a1[:, None, :], 0.0)
    # Attention Linear(D, 1) == lane reduction against its weight row.
    logits = jnp.sum(h_att * a2, axis=-1)                               # (tb, L)

    # Masked exp-normalization.  The row-max shift cancels exactly (as does the
    # uniform att_b2 bias) and keeps jnp.exp from overflowing.
    logits = logits - jnp.max(logits, axis=1, keepdims=True)
    alpha = jnp.exp(logits) * mask
    alpha = alpha / (jnp.sum(alpha, axis=1, keepdims=True) + _EPS)

    # Attention-weighted aggregation, then the final tanh(Linear(D, D)) against a
    # lane-dense (>=128 col) zero-padded weight; padded cols give tanh(0) = 0.
    agg = jnp.sum(alpha[:, :, None] * x_ia, axis=1)                     # (tb, D)
    o_ref[...] = jnp.tanh(
        jnp.dot(agg, wa_ref[...], preferred_element_type=jnp.float32) + ba)


def dev_model_forward(uids, u_item_pad, params, *, tile_b=None,
                      compute_dtype=jnp.bfloat16):
    """JAX/Pallas forward of _DevModel.

    uids:          (B,)      int32 user ids
    u_item_pad:    (B, L, 2) int32; [..., 0] = item id (0 == PAD), [..., 1] = rating id
    params:        dict with embedding tables + PyTorch-layout Linear weights
    tile_b:        batch rows per grid step (None -> auto)
    compute_dtype: dtype of the streamed embeddings / big-matmul operands
                   (accumulation and all activation math stay in f32)
    """
    B, L = u_item_pad.shape[0], u_item_pad.shape[1]
    D = params["item_emb"].shape[1]

    if tile_b is None:
        tile_b = _choose_tile_b(B)
    tile_b = max(8, _round_up(min(tile_b, _round_up(B, 8)), 8))
    L_pad = _round_up(L, 16)                         # sublane-safe for bf16 too
    B_pad = _round_up(B, tile_b)
    N_pad = _round_up(D, _LANE)                      # lane-dense output width
    V_pad = _round_up(max(N_pad, 2 * D), _LANE)      # packed-constant width

    item_ids = u_item_pad[:, :, 0]
    rate_ids = u_item_pad[:, :, 1]

    # Embedding gathers stay in XLA (data-dependent gather); cast the tables first so
    # the gathered/concatenated (B, L, 2D) stream is already in the cheap dtype.
    # TODO(synk): for production B*L (esp. v5e) move the gather in-kernel (scalar-
    # prefetched id tables / manual DMA) to avoid the extra HBM write+read pass.
    q_a = jnp.take(params["item_emb"].astype(compute_dtype), item_ids, axis=0)
    er = jnp.take(params["rate_emb"].astype(compute_dtype), rate_ids, axis=0)
    qe = jnp.concatenate([q_a, er], axis=-1)                            # (B, L, 2D)
    qe = jnp.pad(qe, ((0, B_pad - B), (0, L_pad - L), (0, 0)))
    qe = qe.reshape(B_pad * L_pad, 2 * D)            # pre-flattened, lane-aligned 2-D

    mask = (item_ids > 0).astype(jnp.float32)
    mask = jnp.pad(mask, ((0, B_pad - B), (0, L_pad - L)))
    p_u = jnp.take(params["user_emb"], uids, axis=0).astype(jnp.float32)
    p_u = jnp.pad(p_u, ((0, B_pad - B), (0, 0)))

    # Weight prep (f32 math; only the big-matmul operands are cast to compute_dtype).
    w1 = params["gv_w1"].T.astype(compute_dtype)                        # (2D, D)
    w2 = params["gv_w2"].T                                              # (D, D)
    a1t = params["att_w1"].T                                            # (2D, D)
    a1x, a1p = a1t[:D], a1t[D:]
    # Fused dependent matmuls: [x_ia | x_ia @ A1x] = h1 @ [W2 | W2@A1x] + bias_big.
    w_big = jnp.concatenate([w2, w2 @ a1x], axis=1).astype(compute_dtype)  # (D, 2D)
    b2 = params["gv_b2"].reshape(1, D)
    bias_big = jnp.concatenate(
        [b2, b2 @ a1x + params["att_b1"].reshape(1, D)], axis=1)        # (1, 2D)
    a1p = a1p.astype(jnp.float32)

    wa = jnp.zeros((D, N_pad), jnp.float32).at[:, :D].set(params["agg_w"].T)

    # Packed small constants: one (8, V_pad) block instead of several tiny streams.
    # att_b2 is omitted: it is uniform over the item axis and cancels exactly under
    # the row-max-shifted exp-normalization in the kernel.
    vecs = jnp.zeros((8, V_pad), jnp.float32)
    vecs = vecs.at[0, :D].set(params["gv_b1"])
    vecs = vecs.at[1, :2 * D].set(bias_big[0])
    vecs = vecs.at[2, :D].set(params["att_w2"].reshape(D))
    vecs = vecs.at[3, :D].set(params["agg_b"])

    grid = (B_pad // tile_b,)
    row_blk = tile_b * L_pad
    const = lambda i: (0, 0)
    # TODO(synk): for large emb_dim, add pipeline_mode=pl.Buffered(1) on the constant
    # index-map weight specs to single-buffer the resident weights.

    out = pl.pallas_call(
        _dev_model_kernel,
        out_shape=jax.ShapeDtypeStruct((B_pad, N_pad), jnp.float32),
        grid_spec=pltpu.PrefetchScalarGridSpec(
            num_scalar_prefetch=0,
            grid=grid,
            in_specs=[
                pl.BlockSpec((row_blk, 2 * D), lambda i: (i, 0)),   # [q_a | e_r]
                pl.BlockSpec((tile_b, L_pad), lambda i: (i, 0)),    # mask
                pl.BlockSpec((tile_b, D), lambda i: (i, 0)),        # p_u
                pl.BlockSpec((2 * D, D), const),                    # W1
                pl.BlockSpec((D, 2 * D), const),                    # [W2 | W2@A1x]
                pl.BlockSpec((D, D), const),                        # A1p
                pl.BlockSpec((D, N_pad), const),                    # W_agg (lane-padded)
                pl.BlockSpec((8, V_pad), const),                    # packed constants
            ],
            out_specs=pl.BlockSpec((tile_b, N_pad), lambda i: (i, 0)),
        ),
        compiler_params=pltpu.CompilerParams(
            dimension_semantics=("parallel",),      # batch tiles shard across v7x TCs
            vmem_limit_bytes=32 * 1024 * 1024,
        ),
    )(qe, mask, p_u, w1, w_big, a1p, wa, vecs)

    return out[:B, :D]


def _init_params(key, n_users, n_items, n_rates, D):
    ks = jax.random.split(key, 13)

    def linear(kw, kb, out_dim, in_dim):
        bound = 1.0 / jnp.sqrt(jnp.float32(in_dim))
        w = jax.random.uniform(kw, (out_dim, in_dim), minval=-bound, maxval=bound,
                               dtype=jnp.float32)
        b = jax.random.uniform(kb, (out_dim,), minval=-bound, maxval=bound,
                               dtype=jnp.float32)
        return w, b

    gv_w1, gv_b1 = linear(ks[0], ks[1], D, 2 * D)       # g_v: Linear(2D, D)
    gv_w2, gv_b2 = linear(ks[2], ks[3], D, D)           # g_v: Linear(D, D)
    att_w1, att_b1 = linear(ks[4], ks[5], D, 2 * D)     # att: Linear(2D, D)
    att_w2, att_b2 = linear(ks[6], ks[7], 1, D)         # att: Linear(D, 1)
    agg_w, agg_b = linear(ks[8], ks[9], D, D)           # aggre: Linear(D, D)
    user_emb = jax.random.normal(ks[10], (n_users, D), dtype=jnp.float32)
    item_emb = jax.random.normal(ks[11], (n_items, D), dtype=jnp.float32)
    rate_emb = jax.random.normal(ks[12], (n_rates, D), dtype=jnp.float32)
    return dict(gv_w1=gv_w1, gv_b1=gv_b1, gv_w2=gv_w2, gv_b2=gv_b2,
                att_w1=att_w1, att_b1=att_b1, att_w2=att_w2, att_b2=att_b2,
                agg_w=agg_w, agg_b=agg_b,
                user_emb=user_emb, item_emb=item_emb, rate_emb=rate_emb)


def dev_model_reference(uids, u_item_pad, p):
    """Pure-JAX reference mirroring the PyTorch _DevModel.forward."""
    item_ids = u_item_pad[:, :, 0]
    rate_ids = u_item_pad[:, :, 1]
    q_a = p["item_emb"][item_ids]
    er = p["rate_emb"][rate_ids]
    mask = (item_ids > 0).astype(jnp.float32)
    B, L, D = q_a.shape
    x = jnp.concatenate([q_a, er], axis=2).reshape(-1, 2 * D)
    h = jnp.tanh(x @ p["gv_w1"].T + p["gv_b1"])
    x_ia = (h @ p["gv_w2"].T + p["gv_b2"]).reshape(B, L, D)
    p_u = p["user_emb"][uids]
    p_i = mask[:, :, None] * p_u[:, None, :]
    xa = jnp.concatenate([x_ia, p_i], axis=2).reshape(-1, 2 * D)
    ha = jnp.maximum(xa @ p["att_w1"].T + p["att_b1"], 0.0)
    alpha = (ha @ p["att_w2"].T + p["att_b2"]).reshape(B, L)
    alpha = jnp.exp(alpha) * mask
    alpha = alpha / (jnp.sum(alpha, axis=1, keepdims=True) + _EPS)
    agg = jnp.sum(alpha[:, :, None] * x_ia, axis=1)
    return jnp.tanh(agg @ p["agg_w"].T + p["agg_b"])


if __name__ == "__main__":
    B, L, D = 16, 16, 32                  # batch, padded item-list length, emb_dim
    n_users, n_items, n_rates = 24, 40, 6

    key = jax.random.PRNGKey(0)
    k_par, k_uid, k_item, k_rate, k_drop = jax.random.split(key, 5)
    params = _init_params(k_par, n_users, n_items, n_rates, D)

    uids = jax.random.randint(k_uid, (B,), 0, n_users, dtype=jnp.int32)
    item_ids = jax.random.randint(k_item, (B, L), 1, n_items, dtype=jnp.int32)
    rate_ids = jax.random.randint(k_rate, (B, L), 1, n_rates, dtype=jnp.int32)
    keep = (jax.random.uniform(k_drop, (B, L)) < 0.7).astype(jnp.int32)  # id 0 == PAD
    item_ids = item_ids * keep
    rate_ids = rate_ids * keep
    u_item_pad = jnp.stack([item_ids, rate_ids], axis=2)

    ref = dev_model_reference(uids, u_item_pad, params)

    # f32-operand path: matches the reference tightly.
    fwd_f32 = jax.jit(functools.partial(dev_model_forward, compute_dtype=jnp.float32))
    out_f32 = jax.block_until_ready(fwd_f32(uids, u_item_pad, params))
    assert out_f32.shape == (B, D)
    assert bool(jnp.all(jnp.isfinite(out_f32)))
    assert jnp.allclose(out_f32, ref, atol=1e-3, rtol=1e-3), \
        float(jnp.max(jnp.abs(out_f32 - ref)))

    # Default bf16-streaming path (f32 accumulation / activations): looser tolerance.
    fwd_bf16 = jax.jit(dev_model_forward)
    out_bf16 = jax.block_until_ready(fwd_bf16(uids, u_item_pad, params))
    assert out_bf16.shape == (B, D)
    assert bool(jnp.all(jnp.isfinite(out_bf16)))
    assert jnp.allclose(out_bf16, ref, atol=5e-2, rtol=5e-2), \
        float(jnp.max(jnp.abs(out_bf16 - ref)))

    print("KERNEL_OK")
</pallas_src>

<mosaic_0001>
module attributes {stable_mosaic.version = 11 : i64} {
  func.func @_dev_model_kernel(%arg0: i32, %arg1: memref<128x64xf32, #tpu.memory_space<vmem>>, %arg2: memref<8x16xf32, #tpu.memory_space<vmem>>, %arg3: memref<8x32xf32, #tpu.memory_space<vmem>>, %arg4: memref<64x32xf32, #tpu.memory_space<vmem>>, %arg5: memref<32x64xf32, #tpu.memory_space<vmem>>, %arg6: memref<32x32xf32, #tpu.memory_space<vmem>>, %arg7: memref<32x128xf32, #tpu.memory_space<vmem>>, %arg8: memref<8x128xf32, #tpu.memory_space<vmem>>, %arg9: memref<8x128xf32, #tpu.memory_space<vmem>>) attributes {dimension_semantics = [#tpu.dimension_semantics<parallel>], iteration_bounds = array<i64: 2>, scalar_prefetch = 0 : i64, scratch_operands = 0 : i64, tpu.core_type = #tpu.core_type<tc>, window_params = [{transform_indices = @transform_0, window_bounds = array<i64: 128, 64>}, {transform_indices = @transform_1, window_bounds = array<i64: 8, 16>}, {transform_indices = @transform_2, window_bounds = array<i64: 8, 32>}, {pipeline_mode = #tpu.pipeline_mode<synchronous>, transform_indices = @transform_3, window_bounds = array<i64: 64, 32>}, {pipeline_mode = #tpu.pipeline_mode<synchronous>, transform_indices = @transform_4, window_bounds = array<i64: 32, 64>}, {pipeline_mode = #tpu.pipeline_mode<synchronous>, transform_indices = @transform_5, window_bounds = array<i64: 32, 32>}, {pipeline_mode = #tpu.pipeline_mode<synchronous>, transform_indices = @transform_6, window_bounds = array<i64: 32, 128>}, {pipeline_mode = #tpu.pipeline_mode<synchronous>, transform_indices = @transform_7, window_bounds = array<i64: 8, 128>}, {transform_indices = @transform_8, window_bounds = array<i64: 8, 128>}]} {
    %c0 = arith.constant 0 : index
    %c0_0 = arith.constant 0 : index
    %0 = vector.load %arg8[%c0, %c0_0] : memref<8x128xf32, #tpu.memory_space<vmem>>, vector<8x128xf32>
    %1 = vector.extract_strided_slice %0 {offsets = [0, 0], sizes = [1, 32], strides = [1, 1]} : vector<8x128xf32> to vector<1x32xf32>
    %2 = vector.extract_strided_slice %0 {offsets = [1, 0], sizes = [1, 64], strides = [1, 1]} : vector<8x128xf32> to vector<1x64xf32>
    %3 = vector.extract_strided_slice %0 {offsets = [2, 0], sizes = [1, 32], strides = [1, 1]} : vector<8x128xf32> to vector<1x32xf32>
    %4 = vector.extract_strided_slice %0 {offsets = [3, 0], sizes = [1, 128], strides = [1, 1]} : vector<8x128xf32> to vector<1x128xf32>
    %c0_1 = arith.constant 0 : index
    %c0_2 = arith.constant 0 : index
    %5 = vector.load %arg2[%c0_1, %c0_2] : memref<8x16xf32, #tpu.memory_space<vmem>>, vector<8x16xf32>
    %c0_3 = arith.constant 0 : index
    %c0_4 = arith.constant 0 : index
    %6 = vector.load %arg1[%c0_3, %c0_4] : memref<128x64xf32, #tpu.memory_space<vmem>>, vector<128x64xf32>
    %c0_5 = arith.constant 0 : index
    %c0_6 = arith.constant 0 : index
    %7 = vector.load %arg4[%c0_5, %c0_6] : memref<64x32xf32, #tpu.memory_space<vmem>>, vector<64x32xf32>
    %cst = arith.constant dense<0.000000e+00> : vector<128x32xf32>
    %8 = tpu.matmul %6, %7, %cst {dimension_numbers = #tpu.dot_dimension_numbers<[1], [0], [0], [1], [0, 0, 1, 1], [], []>} : vector<128x64xf32>, vector<64x32xf32>, vector<128x32xf32> -> vector<128x32xf32>
    %9 = vector.broadcast %1 : vector<1x32xf32> to vector<128x32xf32>
    %10 = arith.addf %8, %9 : vector<128x32xf32>
    %11 = math.tanh %10 : vector<128x32xf32>
    %c0_7 = arith.constant 0 : index
    %c0_8 = arith.constant 0 : index
    %12 = vector.load %arg5[%c0_7, %c0_8] : memref<32x64xf32, #tpu.memory_space<vmem>>, vector<32x64xf32>
    %cst_9 = arith.constant dense<0.000000e+00> : vector<128x64xf32>
    %13 = tpu.matmul %11, %12, %cst_9 {dimension_numbers = #tpu.dot_dimension_numbers<[1], [0], [0], [1], [0, 0, 1, 1], [], []>} : vector<128x32xf32>, vector<32x64xf32>, vector<128x64xf32> -> vector<128x64xf32>
    %14 = vector.broadcast %2 : vector<1x64xf32> to vector<128x64xf32>
    %15 = arith.addf %13, %14 : vector<128x64xf32>
    %16 = vector.extract_strided_slice %15 {offsets = [0, 0], sizes = [128, 32], strides = [1, 1]} : vector<128x64xf32> to vector<128x32xf32>
    %17 = vector.shape_cast %16 : vector<128x32xf32> to vector<8x16x32xf32>
    %18 = vector.extract_strided_slice %15 {offsets = [0, 32], sizes = [128, 32], strides = [1, 1]} : vector<128x64xf32> to vector<128x32xf32>
    %19 = vector.shape_cast %18 : vector<128x32xf32> to vector<8x16x32xf32>
    %c0_10 = arith.constant 0 : index
    %c0_11 = arith.constant 0 : index
    %20 = vector.load %arg3[%c0_10, %c0_11] : memref<8x32xf32, #tpu.memory_space<vmem>>, vector<8x32xf32>
    %c0_12 = arith.constant 0 : index
    %c0_13 = arith.constant 0 : index
    %21 = vector.load %arg6[%c0_12, %c0_13] : memref<32x32xf32, #tpu.memory_space<vmem>>, vector<32x32xf32>
    %cst_14 = arith.constant dense<0.000000e+00> : vector<8x32xf32>
    %22 = tpu.matmul %20, %21, %cst_14 {dimension_numbers = #tpu.dot_dimension_numbers<[1], [0], [0], [1], [0, 0, 1, 1], [], []>} : vector<8x32xf32>, vector<32x32xf32>, vector<8x32xf32> -> vector<8x32xf32>
    %23 = vector.shape_cast %5 : vector<8x16xf32> to vector<8x16x1xf32>
    %24 = vector.shape_cast %22 : vector<8x32xf32> to vector<8x1x32xf32>
    %25 = vector.broadcast %23 : vector<8x16x1xf32> to vector<8x16x32xf32>
    %26 = vector.broadcast %24 : vector<8x1x32xf32> to vector<8x16x32xf32>
    %27 = arith.mulf %25, %26 : vector<8x16x32xf32>
    %28 = arith.addf %19, %27 : vector<8x16x32xf32>
    %cst_15 = arith.constant 0.000000e+00 : f32
    %29 = vector.broadcast %cst_15 : f32 to vector<8x16x32xf32>
    %30 = arith.maximumf %28, %29 : vector<8x16x32xf32>
    %31 = vector.shape_cast %3 : vector<1x32xf32> to vector<1x1x32xf32>
    %32 = vector.broadcast %31 : vector<1x1x32xf32> to vector<8x16x32xf32>
    %33 = arith.mulf %30, %32 : vector<8x16x32xf32>
    %cst_16 = arith.constant dense<0.000000e+00> : vector<8x16xf32>
    %34 = vector.multi_reduction <add>, %33, %cst_16 [2] : vector<8x16x32xf32> to vector<8x16xf32>
    %cst_17 = arith.constant dense<0xFF800000> : vector<8xf32>
    %35 = vector.multi_reduction <maximumf>, %34, %cst_17 [1] : vector<8x16xf32> to vector<8xf32>
    %36 = vector.shape_cast %35 : vector<8xf32> to vector<8x1xf32>
    %37 = vector.broadcast %36 : vector<8x1xf32> to vector<8x16xf32>
    %38 = arith.subf %34, %37 : vector<8x16xf32>
    %39 = math.exp %38 : vector<8x16xf32>
    %40 = arith.mulf %39, %5 : vector<8x16xf32>
    %cst_18 = arith.constant dense<0.000000e+00> : vector<8xf32>
    %41 = vector.multi_reduction <add>, %40, %cst_18 [1] : vector<8x16xf32> to vector<8xf32>
    %42 = vector.shape_cast %41 : vector<8xf32> to vector<8x1xf32>
    %cst_19 = arith.constant 1.000000e-10 : f32
    %43 = vector.broadcast %cst_19 : f32 to vector<8x1xf32>
    %44 = arith.addf %42, %43 : vector<8x1xf32>
    %45 = vector.broadcast %44 : vector<8x1xf32> to vector<8x16xf32>
    %46 = arith.divf %40, %45 : vector<8x16xf32>
    %47 = vector.shape_cast %46 : vector<8x16xf32> to vector<8x16x1xf32>
    %48 = vector.broadcast %47 : vector<8x16x1xf32> to vector<8x16x32xf32>
    %49 = arith.mulf %48, %17 : vector<8x16x32xf32>
    %cst_20 = arith.constant dense<0.000000e+00> : vector<8x32xf32>
    %50 = vector.multi_reduction <add>, %49, %cst_20 [1] : vector<8x16x32xf32> to vector<8x32xf32>
    %c0_21 = arith.constant 0 : index
    %c0_22 = arith.constant 0 : index
    %51 = vector.load %arg7[%c0_21, %c0_22] : memref<32x128xf32, #tpu.memory_space<vmem>>, vector<32x128xf32>
    %cst_23 = arith.constant dense<0.000000e+00> : vector<8x128xf32>
    %52 = tpu.matmul %50, %51, %cst_23 {dimension_numbers = #tpu.dot_dimension_numbers<[1], [0], [0], [1], [0, 0, 1, 1], [], []>} : vector<8x32xf32>, vector<32x128xf32>, vector<8x128xf32> -> vector<8x128xf32>
    %53 = vector.broadcast %4 : vector<1x128xf32> to vector<8x128xf32>
    %54 = arith.addf %52, %53 : vector<8x128xf32>
    %55 = math.tanh %54 : vector<8x128xf32>
    %c0_24 = arith.constant 0 : index
    %c0_25 = arith.constant 0 : index
    %56 = vector.load %arg9[%c0_24, %c0_25] : memref<8x128xf32, #tpu.memory_space<vmem>>, vector<8x128xf32>
    tpu.vector_store %arg9[%c0_24, %c0_25], %55 {strides = array<i32>} : memref<8x128xf32, #tpu.memory_space<vmem>>, vector<8x128xf32>,
    return
  }
  func.func @transform_0(%arg0: i32) -> (i32, i32) {
    %c0_i32 = arith.constant 0 : i32
    %c0_i32_0 = arith.constant 0 : i32
    return %arg0, %c0_i32 : i32, i32
  }
  func.func @transform_1(%arg0: i32) -> (i32, i32) {
    %c0_i32 = arith.constant 0 : i32
    %c0_i32_0 = arith.constant 0 : i32
    return %arg0, %c0_i32 : i32, i32
  }
  func.func @transform_2(%arg0: i32) -> (i32, i32) {
    %c0_i32 = arith.constant 0 : i32
    %c0_i32_0 = arith.constant 0 : i32
    return %arg0, %c0_i32 : i32, i32
  }
  func.func @transform_3(%arg0: i32) -> (i32, i32) {
    %c0_i32 = arith.constant 0 : i32
    %c0_i32_0 = arith.constant 0 : i32
    %c0_i32_1 = arith.constant 0 : i32
    return %c0_i32, %c0_i32_0 : i32, i32
  }
  func.func @transform_4(%arg0: i32) -> (i32, i32) {
    %c0_i32 = arith.constant 0 : i32
    %c0_i32_0 = arith.constant 0 : i32
    %c0_i32_1 = arith.constant 0 : i32
    return %c0_i32, %c0_i32_0 : i32, i32
  }
  func.func @transform_5(%arg0: i32) -> (i32, i32) {
    %c0_i32 = arith.constant 0 : i32
    %c0_i32_0 = arith.constant 0 : i32
    %c0_i32_1 = arith.constant 0 : i32
    return %c0_i32, %c0_i32_0 : i32, i32
  }
  func.func @transform_6(%arg0: i32) -> (i32, i32) {
    %c0_i32 = arith.constant 0 : i32
    %c0_i32_0 = arith.constant 0 : i32
    %c0_i32_1 = arith.constant 0 : i32
    return %c0_i32, %c0_i32_0 : i32, i32
  }
  func.func @transform_7(%arg0: i32) -> (i32, i32) {
    %c0_i32 = arith.constant 0 : i32
    %c0_i32_0 = arith.constant 0 : i32
    %c0_i32_1 = arith.constant 0 : i32
    return %c0_i32, %c0_i32_0 : i32, i32
  }
  func.func @transform_8(%arg0: i32) -> (i32, i32) {
    %c0_i32 = arith.constant 0 : i32
    %c0_i32_0 = arith.constant 0 : i32
    return %arg0, %c0_i32 : i32, i32
  }
}

</mosaic_0001>

<bundles_post_ra>
// kernel: dev_model_forward.1
= control target key start
LH: loop header
LB: loop body
LE: loop exit
PB: predicated region body
PF: predicated region fallthrough
CT: control target
= control target key end

     0   :  { %13 = vsyncpa [#allocation3], 0  ;;  %s3421_s0 = inlined_call_operand.vmem [shape: f32[256,64], index: 0, kind: input, shape index: {}]   ;;  %s3422_s1 = inlined_call_operand.vmem [shape: f32[16,16], index: 1, kind: input, shape index: {}]   ;;  %s3423_s2 = inlined_call_operand.vmem [shape: f32[16,32], index: 2, kind: input, shape index: {}]   ;;  %s3424_s3 = inlined_call_operand.vmem [shape: f32[64,32], index: 3, kind: input, shape index: {}]   ;;  %s3425_s4 = inlined_call_operand.vmem [shape: f32[32,64], index: 4, kind: input, shape index: {}]   ;;  %s3426_s5 = inlined_call_operand.vmem [shape: f32[32,32], index: 5, kind: input, shape index: {}]   ;;  %s3427_s6 = inlined_call_operand.vmem [shape: f32[32,128], index: 6, kind: input, shape index: {}]   ;;  %s3428_s7 = inlined_call_operand.vmem [shape: f32[8,128], index: 7, kind: input, shape index: {}]   ;;  %s3429_s8 = inlined_call_operand.hbm [shape: f32[16,128], index: 8, kind: output, shape index: {}]  }
   0x1   :  { %15 = vsyncpa [#allocation3 + $0x1], 0  ;;  %s2621_s27 = smov 0   ;;  %s2623_s28 = smov 0  }
   0x2   :  { %s2625_s29 = smov 0   ;;  %s2627_s30 = smov 0  }
   0x3 LB: > { %s2642_s9 = sadd.s32 4294967295, %s2567_s30   ;;  %s2182_s10 = sadd.s32 4294967294, %s2567_s30   ;;  %s2567_s30 = sphi %s2627_s30, %s3441_s30   ;;  %s2563_s29 = sphi %s2625_s29, %s3440_s29   ;;  %s2559_s28 = sphi %s2623_s28, %s3439_s28   ;;  %s2555_s27 = sphi %s2621_s27, %s3438_s27  }
   0x4   : > { %s2646_s11 = sadd.s32 1, %s2567_s30   ;;  %s211_s12 = sadd.s32 1, %s2563_s29 }
   0x5   : > { %s208_s13 = ssub.s32 %s2567_s30, %s2646_s11  ;;  %p221_p0 = scmp.ne.s32.totalorder %s2563_s29, %s2559_s28 }
   0x6   : > { %p209_p1 = scmp.eq.s32.totalorder %s208_s13, 0  ;;  %p222_p2 = scmp.eq.s32.totalorder %s2642_s9, 1 }
   0x7   : > { %p227_p3 = scmp.ne.s32.totalorder %s2559_s28, %s2555_s27  ;;  %p228_p4 = scmp.eq.s32.totalorder %s2182_s10, 1 }
   0x8   : > { %s2657_s14 = scalar_select %p209_p1, %s2563_s29, %s211_s12  }
   0x9   : > { %p2659_p5 = por %p222_p2, %p221_p0  ;;  %p2663_p6 = por %p228_p4, %p227_p3 }
   0xa   : > { %p2185_p7 = scmp.ge.s32.totalorder %s2567_s30, 1  ;;  %p284_p8 = scmp.lt.s32.totalorder %s2567_s30, 3 }
   0xc   : > { %p285_p9 = pnand %p2185_p7, %p284_p8 }
   0xe   : > { %288 = sbr.rel (%p285_p9) target bundleno = 1782 (0x6f6), region = 52 }
  0x13   : > { %v365_v0 = vld [vmem:[%s3424_s3 + $0x38] sm:$0xff]  ;;  %v364_v1 = vld [vmem:[%s3424_s3 + $0x30] sm:$0xff]  ;;  %s2187_s21 = sshll.u32 %s2642_s9, 4  ;;  %v363_v2 = vld [vmem:[%s3424_s3 + $0x28] sm:$0xff]  ;;  %vm370_vm0 = vcmask 523264   ;;  %v3430_v28 = vmov 0.0   ;;  %v366_v29 = vlaneseq }
  0x14   : > { %2283 = vmatprep.subr.mxu0 %v365_v0  ;;  %p327_p10 = scmp.lt.s32.totalorder %s2187_s21, 31  ;;  %v362_v3 = vld [vmem:[%s3424_s3 + $0x20] sm:$0xff]  ;;  %v361_v4 = vld [vmem:[%s3424_s3 + $0x18] sm:$0xff]  ;;  %v360_v6 = vld [vmem:[%s3424_s3 + $0x10] sm:$0xff]  ;;  %p332_p11 = scmp.lt.s32.totalorder %s2642_s9, 1  ;;  %vm2570_vm1 = vmmov 0  }
  0x15   : > { %2284 = vmatpush3.msra.mxu0 %v365_v0  ;;  %v359_v7 = vld [vmem:[%s3424_s3 + $0x8] sm:$0xff]  ;;  %v358_v8 = vld [vmem:[%s3424_s3] sm:$0xff]  ;;  %v583_v24 = vld [vmem:[%s3425_s4 + $0x18] sm:$0xff]  ;;  %v2747_v30 = vshrl.u32 %v366_v29, 7  ;;  %vm588_vm2 = vcmask 261120   ;;  %s2571_s10 = smov 32  }
  0x16   : > { %2285 = vmatprep.subr.mxu0 %v364_v1  ;;  %s3443_s21 = smov (!%p327_p10, %s2187_s21), 31  ;;  %2323 = vmatprep.subr.mxu1 %v583_v24  ;;  %v582_v25 = vld [vmem:[%s3425_s4 + $0x10] sm:$0xff]  ;;  %v581_v26 = vld [vmem:[%s3425_s4 + $0x8] sm:$0xff]  ;;  %v580_v27 = vld [vmem:[%s3425_s4] sm:$0xff]  ;;  %vm1313_vm3 = vcmask 130112   ;;  %vm1378_vm4 = vcmask 1041409  }
  0x17   : > { %2286 = vmatpush3.msra.mxu0 %v364_v1  ;;  %s2188_s26 = sshll.u32 %s3443_s21, 3  ;;  %2324 = vmatpush3.msra.mxu1 %v583_v24  ;;  %v2756_v31 = vsub.s32 0, %v2747_v30  ;;  %v2764_v33 = vsub.s32 1, %v2747_v30  ;;  %v2774_v36 = vsub.s32 2, %v2747_v30  ;;  %v2782_v38 = vsub.s32 3, %v2747_v30  ;;  %v2827_v48 = vld [vmem:[%s3428_s7] sm:$0xff] }
  0x18   : > { %2287 = vmatprep.subr.mxu0 %v363_v2  ;;  %s2688_s18 = scalar_lea.vmem %s3421_s0, %s2188_s26  ;;  %2325 = vmatprep.subr.mxu1 %v582_v25  ;;  %v2790_v40 = vsub.s32 4, %v2747_v30  ;;  %v2798_v42 = vsub.s32 5, %v2747_v30  ;;  %v2806_v44 = vsub.s32 6, %v2747_v30  ;;  %v2814_v46 = vsub.s32 7, %v2747_v30  ;;  %s2575_s23 = smov [#allocation2]  }
  0x19   : > { %2288 = vmatpush3.msra.mxu0 %v363_v2  ;;  %v342_v5 = vld [vmem:[%s2688_s18] sm:$0xff]  ;;  %v343_v9 = vld [vmem:[%s2688_s18 + $0x8] sm:$0xff]  ;;  %v344_v10 = vld [vmem:[%s2688_s18 + $0x10] sm:$0xff]  ;;  %2326 = vmatpush3.msra.mxu1 %v582_v25  ;;  %s2750_s20 = scalar_select %p332_p11, %s2642_s9, 1  ;;  %v2831_v49 = vrot.slane %v2827_v48, %v2756_v31  ;;  %vm1380_vm5 = vcmask 1042434   ;;  %vm1382_vm6 = vcmask 1043459  }
  0x1a   : > { %2289 = vmatprep.subr.mxu0 %v362_v3  ;;  %2299 = vmatprep.mubr.msk.f32.mxu0 %vm370_vm0, %v342_v5  ;;  %v345_v11 = vld [vmem:[%s2688_s18 + $0x18] sm:$0xff]  ;;  %v346_v12 = vld [vmem:[%s2688_s18 + $0x20] sm:$0xff]  ;;  %v347_v13 = vld [vmem:[%s2688_s18 + $0x28] sm:$0xff]  ;;  %vm1384_vm7 = vcmask 1044484   ;;  %vm1386_vm8 = vcmask 1045509   ;;  %vm1388_vm9 = vcmask 1046534  }
  0x1b   : > { %2290 = vmatpush3.msra.mxu0 %v362_v3  ;;  %v348_v14 = vld [vmem:[%s2688_s18 + $0x30] sm:$0xff]  ;;  %v349_v15 = vld [vmem:[%s2688_s18 + $0x38] sm:$0xff]  ;;  %v350_v16 = vld [vmem:[%s2688_s18 + $0x40] sm:$0xff]  ;;  %2327 = vmatprep.subr.mxu1 %v581_v26  ;;  %s2189_s21 = sshll.u32 %s2750_s20, 3  ;;  %s2573_s20 = smov 96   ;;  %vm1390_vm10 = vcmask 1047559  }
  0x1c   : > { %2291 = vmatprep.subr.mxu0 %v361_v4  ;;  %v351_v17 = vld [vmem:[%s2688_s18 + $0x48] sm:$0xff]  ;;  %v352_v18 = vld [vmem:[%s2688_s18 + $0x50] sm:$0xff]  ;;  %v353_v19 = vld [vmem:[%s2688_s18 + $0x58] sm:$0xff]  ;;  %2328 = vmatpush3.msra.mxu1 %v581_v26  ;;  %s335_s24 = scalar_lea.vmem %s3422_s1, %s2189_s21  ;;  %s339_s26 = scalar_lea.vmem %s3423_s2, %s2189_s21  ;;  %vm1393_vm11 = vcmask 130048  }
  0x1d   : > { %2292 = vmatpush3.msra.mxu0 %v361_v4  ;;  %v354_v20 = vld [vmem:[%s2688_s18 + $0x60] sm:$0xff]  ;;  %v355_v21 = vld [vmem:[%s2688_s18 + $0x68] sm:$0xff]  ;;  %v356_v22 = vld [vmem:[%s2688_s18 + $0x70] sm:$0xff]  ;;  %2329 = vmatprep.subr.mxu1 %v580_v27 }
  0x1e   : > { %2293 = vmatprep.subr.mxu0 %v360_v6  ;;  %v357_v23 = vld [vmem:[%s2688_s18 + $0x78] sm:$0xff]  ;;  %2330 = vmatpush3.msra.mxu1 %v580_v27  ;;  %v341_v32 = vld [vmem:[%s335_s24] sm:$0xff]  ;;  %s2511_s24 = sshll.u32 %s2575_s23, 4  ;;  %s2512_s24 = int_to_ptr.vmem [resolvable:$false] %s2511_s24 }
  0x1f   : > { %2294 = vmatpush3.msra.mxu0 %v360_v6  ;;  %2355 = vmatprep.subr.mxu1 %v3430_v28  ;;  %v2767_v34 = vrot.slane %v341_v32, %v2756_v31  ;;  %v2770_v35 = vrot.slane %v341_v32, %v2764_v33  ;;  %v2779_v37 = vrot.slane %v341_v32, %v2774_v36  ;;  %v786_v6 = vld [vmem:[%s3426_s5 + $0x18] sm:$0xff] }
  0x20   : > { %2295 = vmatprep.subr.mxu0 %v359_v7  ;;  %v2787_v39 = vrot.slane %v341_v32, %v2782_v38  ;;  %v2795_v41 = vrot.slane %v341_v32, %v2790_v40  ;;  %v2803_v43 = vrot.slane %v341_v32, %v2798_v42  ;;  %v2811_v45 = vrot.slane %v341_v32, %v2806_v44 }
  0x21   : > { %2296 = vmatpush3.msra.mxu0 %v359_v7  ;;  %865 = vbcast.lane.b32.xlu0 %v2767_v34, 256  ;;  %v2819_v47 = vrot.slane %v341_v32, %v2814_v46 }
  0x22   : > { %2297 = vmatprep.subr.mxu0 %v358_v8  ;;  %876 = vbcast.lane.b32.xlu1 %v2770_v35, 256 }
  0x23   : > { %2298 = vmatpush3.msra.mxu0 %v358_v8 }
  0x24   : > { %2300 = vmatmul.mubr.msk.f32.vlgmr.msra.gmra.mxu0 %vm370_vm0, %v343_v9  ;;  %2366 = vmatprep.subr.mxu0 %v3430_v28 }
  0x25   : > { %2302 = vmatprep.mubr.msk.f32.mxu0 %vm370_vm0, %v344_v10  ;;  %869 = vbcast.lane.b32.xlu0 %v2767_v34, 264  ;;  %v785_v10 = vld [vmem:[%s3426_s5 + $0x10] sm:$0xff] }
  0x26   : > { %880 = vbcast.lane.b32.xlu1 %v2770_v35, 264 }
  0x28   : > { %2303 = vmatmul.mubr.msk.f32.gmra.mxu0 %vm370_vm0, %v345_v11 }
  0x29   : > { %2305 = vmatprep.mubr.msk.f32.mxu0 %vm370_vm0, %v346_v12  ;;  %887 = vbcast.lane.b32.xlu0 %v2779_v37, 256 }
  0x2a   : > { %891 = vbcast.lane.b32.xlu1 %v2779_v37, 264 }
  0x2c   : > { %2306 = vmatmul.mubr.msk.f32.gmra.mxu0 %vm370_vm0, %v347_v13 }
  0x2d   : > { %2308 = vmatprep.mubr.msk.f32.mxu0 %vm370_vm0, %v348_v14  ;;  %898 = vbcast.lane.b32.xlu0 %v2787_v39, 256  ;;  %v784_v14 = vld [vmem:[%s3426_s5 + $0x8] sm:$0xff] }
  0x2e   : > { %902 = vbcast.lane.b32.xlu1 %v2787_v39, 264 }
  0x30   : > { %2309 = vmatmul.mubr.msk.f32.gmra.mxu0 %vm370_vm0, %v349_v15 }
  0x31   : > { %2311 = vmatprep.mubr.msk.f32.mxu0 %vm370_vm0, %v350_v16  ;;  %909 = vbcast.lane.b32.xlu0 %v2795_v41, 256 }
  0x32   : > { %913 = vbcast.lane.b32.xlu1 %v2795_v41, 264 }
  0x34   : > { %2312 = vmatmul.mubr.msk.f32.gmra.mxu0 %vm370_vm0, %v351_v17 }
  0x35   : > { %2314 = vmatprep.mubr.msk.f32.mxu0 %vm370_vm0, %v352_v18  ;;  %920 = vbcast.lane.b32.xlu0 %v2803_v43, 256  ;;  %v783_v18 = vld [vmem:[%s3426_s5] sm:$0xff] }
  0x36   : > { %924 = vbcast.lane.b32.xlu1 %v2803_v43, 264 }
  0x38   : > { %2315 = vmatmul.mubr.msk.f32.gmra.mxu0 %vm370_vm0, %v353_v19 }
  0x39   : > { %2317 = vmatprep.mubr.msk.f32.mxu0 %vm370_vm0, %v354_v20  ;;  %931 = vbcast.lane.b32.xlu0 %v2811_v45, 256 }
  0x3a   : > { %935 = vbcast.lane.b32.xlu1 %v2811_v45, 264 }
  0x3c   : > { %2318 = vmatmul.mubr.msk.f32.gmra.mxu0 %vm370_vm0, %v355_v21 }
  0x3d   : > { %2320 = vmatprep.mubr.msk.f32.mxu0 %vm370_vm0, %v356_v22  ;;  %942 = vbcast.lane.b32.xlu0 %v2819_v47, 256 }
  0x3e   : > { %946 = vbcast.lane.b32.xlu1 %v2819_v47, 264 }
  0x40   : > { %2321 = vmatmul.mubr.msk.f32.gmra.mxu0 %vm370_vm0, %v357_v23 }
  0x41   : > { %2374 = vmatprep.mubr.msk.f32.mxu0 %vm2570_vm1, %v3430_v28 }
  0xe4   : > { %v2301_v50 = vpop.f32.mrf.mxu0 }
  0xe5   : > { %v491_v51 = vadd.f32 %v2301_v50, %v2831_v49 }
  0xe6   : > { %v485_v52 = vpop.f32.mrf.mxu0 }
  0xe7   : > { %v486_v53 = vadd.f32 %v485_v52, %v2831_v49 }
  0xe8   : > { %v2304_v54 = vpop.f32.mrf.mxu0 }
  0xe9   : > { %2424 = vtanh.f32 %v486_v53  ;;  %v501_v55 = vadd.f32 %v2304_v54, %v2831_v49 }
  0xea   : > { %2426 = vtanh.f32 %v491_v51  ;;  %v495_v56 = vpop.f32.mrf.mxu0 }
  0xeb   : > { %v496_v57 = vadd.f32 %v495_v56, %v2831_v49 }
  0xec   : > { %v2307_v58 = vpop.f32.mrf.mxu0 }
  0xed   : > { %2428 = vtanh.f32 %v496_v57  ;;  %v511_v59 = vadd.f32 %v2307_v58, %v2831_v49  ;;  %v782_v58 = vld [vmem:[%s339_s26] sm:$0xff]  ;;  %s323_s26 = sand.u32 1, %s2559_s28  }
  0xee   : > { %2430 = vtanh.f32 %v501_v55  ;;  %v505_v60 = vpop.f32.mrf.mxu0  ;;  %s2086_s19 = scalar_lea.sflag [#allocation3], %s323_s26 }
  0xef   : > { %v506_v61 = vadd.f32 %v505_v60, %v2831_v49 }
  0xf0   : > { %v2310_v62 = vpop.f32.mrf.mxu0 }
  0xf1   : > { %2432 = vtanh.f32 %v506_v61  ;;  %v521_v63 = vadd.f32 %v2310_v62, %v2831_v49 }
  0xf2   : > { %2434 = vtanh.f32 %v511_v59  ;;  %v515_v0 = vpop.f32.mrf.mxu0  ;;  %v1153_v59 = vrot.slane %v2827_v48, %v2774_v36 }
  0xf3   : > { %v516_v1 = vadd.f32 %v515_v0, %v2831_v49 }
  0xf4   : > { %v2313_v2 = vpop.f32.mrf.mxu0  ;;  %1155 = vrot.lane.b32.xlu0 %v1153_v59, %s2571_s10 }
  0xf5   : > { %2436 = vtanh.f32 %v516_v1  ;;  %v531_v4 = vadd.f32 %v2313_v2, %v2831_v49 }
  0xf6   : > { %v2425_v3 = vpop.eup %2424  ;;  %2438 = vtanh.f32 %v521_v63  ;;  %v525_v5 = vpop.f32.mrf.mxu0 }
  0xf7   : > { %v2427_v7 = vpop.eup %2426  ;;  %v526_v8 = vadd.f32 %v525_v5, %v2831_v49  ;;  %2331 = vmatprep.mubr.msk.f32.mxu1 %vm588_vm2, %v2425_v3 }
  0xf8   : > { %v2316_v9 = vpop.f32.mrf.mxu0  ;;  %2332 = vmatmul.mubr.msk.f32.vlgmr.msra.gmra.mxu1 %vm588_vm2, %v2427_v7  ;;  %v2572_v7 = vmov 1966171168  }
  0xf9   : > { %2440 = vtanh.f32 %v526_v8  ;;  %2356 = vmatpush3.msra.mxu1 %v786_v6  ;;  %v541_v12 = vadd.f32 %v2316_v9, %v2831_v49  ;;  %v951_v8 = vunpack.c.l.s4 %v2572_v7 }
  0xfa   : > { %v2429_v11 = vpop.eup %2428  ;;  %2442 = vtanh.f32 %v531_v4  ;;  %v535_v13 = vpop.f32.mrf.mxu0  ;;  %2357 = vmatprep.subr.mxu1 %v3430_v28 }
  0xfb   : > { %v2431_v15 = vpop.eup %2430  ;;  %v536_v16 = vadd.f32 %v535_v13, %v2831_v49  ;;  %2334 = vmatprep.mubr.msk.f32.mxu1 %vm588_vm2, %v2429_v11  ;;  %2358 = vmatpush3.msra.mxu1 %v785_v10  ;;  %v877_v10 = vpop.permute.xlu1 %876  ;;  %v952_v13 = vunpack.c.0.s8 %v951_v8 }
  0xfc   : > { %v2319_v17 = vpop.f32.mrf.mxu0  ;;  %2335 = vmatmul.mubr.msk.f32.gmra.mxu1 %vm588_vm2, %v2431_v15  ;;  %2359 = vmatprep.subr.mxu1 %v3430_v28  ;;  %v866_v11 = vpop.permute.xlu0 %865 }
  0xfd   : > { %2444 = vtanh.f32 %v536_v16  ;;  %2360 = vmatpush3.msra.mxu1 %v784_v14  ;;  %v551_v20 = vadd.f32 %v2319_v17, %v2831_v49 }
  0xfe   : > { %v2433_v19 = vpop.eup %2432  ;;  %2446 = vtanh.f32 %v541_v12  ;;  %v545_v21 = vpop.f32.mrf.mxu0  ;;  %2361 = vmatprep.subr.mxu1 %v3430_v28 }
  0xff   : > { %v2435_v22 = vpop.eup %2434  ;;  %v546_v23 = vadd.f32 %v545_v21, %v2831_v49  ;;  %2337 = vmatprep.mubr.msk.f32.mxu1 %vm588_vm2, %v2433_v19  ;;  %2362 = vmatpush3.msra.mxu1 %v783_v18  ;;  %v881_v16 = vpop.permute.xlu1 %880  ;;  %v955_v18 = vsub.s32 %v952_v13, %v2747_v30 }
 0x100   : > { %v2322_v24 = vpop.f32.mrf.mxu0  ;;  %2338 = vmatmul.mubr.msk.f32.gmra.mxu1 %vm588_vm2, %v2435_v22  ;;  %v870_v17 = vpop.permute.xlu0 %869 }
 0x101   : > { %2448 = vtanh.f32 %v546_v23  ;;  %v561_v26 = vadd.f32 %v2322_v24, %v2831_v49 }
 0x102   : > { %v2437_v25 = vpop.eup %2436  ;;  %2450 = vtanh.f32 %v551_v20  ;;  %v555_v27 = vpop.f32.mrf.mxu0 }
 0x103   : > { %v2439_v32 = vpop.eup %2438  ;;  %v556_v50 = vadd.f32 %v555_v27, %v2831_v49  ;;  %2340 = vmatprep.mubr.msk.f32.mxu1 %vm588_vm2, %v2437_v25  ;;  %v892_v23 = vpop.permute.xlu1 %891 }
 0x104   : > { %2341 = vmatmul.mubr.msk.f32.gmra.mxu1 %vm588_vm2, %v2439_v32  ;;  %v888_v24 = vpop.permute.xlu0 %887 }
 0x105   : > { %2452 = vtanh.f32 %v556_v50 }
 0x106   : > { %v2441_v51 = vpop.eup %2440  ;;  %2454 = vtanh.f32 %v561_v26 }
 0x107   : > { %v2443_v52 = vpop.eup %2442  ;;  %2343 = vmatprep.mubr.msk.f32.mxu1 %vm588_vm2, %v2441_v51 }
 0x108   : > { %2344 = vmatmul.mubr.msk.f32.gmra.mxu1 %vm588_vm2, %v2443_v52 }
 0x10a   : > { %v2445_v53 = vpop.eup %2444 }
 0x10b   : > { %v2447_v54 = vpop.eup %2446  ;;  %2346 = vmatprep.mubr.msk.f32.mxu1 %vm588_vm2, %v2445_v53 }
 0x10c   : > { %2347 = vmatmul.mubr.msk.f32.gmra.mxu1 %vm588_vm2, %v2447_v54 }
 0x10e   : > { %v2449_v49 = vpop.eup %2448 }
 0x10f   : > { %v2451_v55 = vpop.eup %2450  ;;  %2349 = vmatprep.mubr.msk.f32.mxu1 %vm588_vm2, %v2449_v49 }
 0x110   : > { %2350 = vmatmul.mubr.msk.f32.gmra.mxu1 %vm588_vm2, %v2451_v55  ;;  %v903_v55 = vpop.permute.xlu1 %902 }
 0x112   : > { %v2453_v56 = vpop.eup %2452 }
 0x113   : > { %v2455_v57 = vpop.eup %2454  ;;  %2352 = vmatprep.mubr.msk.f32.mxu1 %vm588_vm2, %v2453_v56  ;;  %v899_v56 = vpop.permute.xlu0 %898 }
 0x114   : > { %2353 = vmatmul.mubr.msk.f32.gmra.mxu1 %vm588_vm2, %v2455_v57  ;;  %v914_v8 = vpop.permute.xlu1 %913 }
 0x115   : > { %2363 = vmatprep.mubr.msk.f32.mxu1 %vm2570_vm1, %v3430_v28 }
 0x117   : > { %v910_v13 = vpop.permute.xlu0 %909 }
 0x118   : > { %2364 = vmatmul.mubr.msk.f32.vlgmr.msra.gmra.mxu1 %vm588_vm2, %v782_v58 }
 0x1b8   : > { %v2891_v60 = vpop.f32.mrf.mxu1 }
 0x1ba   : > { %v2893_v61 = vpop.f32.mrf.mxu1 }
 0x1bc   : > { %v2895_v62 = vpop.f32.mrf.mxu1 }
 0x1be   : > { %v2897_v63 = vpop.f32.mrf.mxu1 }
 0x1c0   : > { %v2899_v0 = vpop.f32.mrf.mxu1 }
 0x1c2   : > { %v2901_v1 = vpop.f32.mrf.mxu1 }
 0x1c4   : > { %v2903_v2 = vpop.f32.mrf.mxu1 }
 0x1c6   : > { %v2905_v3 = vpop.f32.mrf.mxu1 }
 0x1c8   : > { %v2907_v4 = vpop.f32.mrf.mxu1 }
 0x1ca   : > { %v2909_v5 = vpop.f32.mrf.mxu1 }
 0x1cc   : > { %v2911_v6 = vpop.f32.mrf.mxu1 }
 0x1ce   : > { %v2913_v9 = vpop.f32.mrf.mxu1 }
 0x1d0   : > { %v2915_v12 = vpop.f32.mrf.mxu1 }
 0x1d2   : > { %v2917_v14 = vpop.f32.mrf.mxu1 }
 0x1d4   : > { %v2919_v15 = vpop.f32.mrf.mxu1 }
 0x1d6   : > { %v2922_v19 = vpop.f32.mrf.mxu1 }
 0x1d8   : > { %v856_v20 = vpop.f32.mrf.mxu1 }
 0x1d9   : > { %v956_v21 = vrot.slane %v856_v20, %v955_v18  ;;  %v949_v25 = vcombine.high %v856_v20, %v856_v20 }
 0x1da   : > { %v2365_v22 = vpop.f32.mrf.mxu1 }
 0x1db   : > { %v964_v26 = vcombine.high %v956_v21, %v956_v21  ;;  %v972_v27 = vrot.slane %v956_v21, %v955_v18  ;;  %v963_v51 = vrot.slane %v949_v25, %v955_v18 }
 0x1dd   : > { %v986_v32 = vrot.slane %v964_v26, %v955_v18  ;;  %v1001_v50 = vrot.slane %v972_v27, %v2756_v31  ;;  %v994_v52 = vcombine.high %v972_v27, %v972_v27  ;;  %v979_v57 = vrot.slane %v963_v51, %v955_v18  ;;  %v925_v27 = vpop.permute.xlu1 %924 }
 0x1df   : > { %v1039_v53 = vmul.f32 %v1001_v50, %v870_v17  ;;  %v1038_v54 = vmul.f32 %v1001_v50, %v866_v11  ;;  %v1005_v49 = vrot.slane %v986_v32, %v2756_v31  ;;  %v1009_v7 = vrot.slane %v994_v52, %v2756_v31  ;;  %v921_v50 = vpop.permute.xlu0 %920 }
 0x1e0   : > { %v965_v11 = vcombine.high %v963_v51, %v963_v51  ;;  %v996_v17 = vcombine.high %v986_v32, %v986_v32  ;;  %v1017_v22 = vrot.slane %v979_v57, %v2756_v31 }
 0x1e1   : > { %1072 = vrot.lane.b32.xlu1 %v1039_v53, %s2571_s10  ;;  %1070 = vrot.lane.b32.xlu0 %v1038_v54, %s2571_s10  ;;  %v1041_v58 = vmul.f32 %v1005_v49, %v881_v16  ;;  %v1040_v59 = vmul.f32 %v1005_v49, %v877_v10  ;;  %v1043_v20 = vmul.f32 %v1009_v7, %v892_v23 }
 0x1e2   : > { %v1042_v21 = vmul.f32 %v1009_v7, %v888_v24  ;;  %v993_v16 = vrot.slane %v965_v11, %v955_v18  ;;  %v1047_v10 = vmul.f32 %v1017_v22, %v914_v8  ;;  %v1046_v25 = vmul.f32 %v1017_v22, %v910_v13  ;;  %v936_v18 = vpop.permute.xlu1 %935 }
 0x1e3   : > { %v1013_v26 = vrot.slane %v996_v17, %v2756_v31  ;;  %v995_v24 = vcombine.high %v979_v57, %v979_v57  ;;  %v932_v52 = vpop.permute.xlu0 %931  ;;  %v2952_v17 = vrot.slane %v2827_v48, %v2764_v33 }
 0x1e4   : > { %v1021_v23 = vrot.slane %v993_v16, %v2756_v31 }
 0x1e5   : > { %1076 = vrot.lane.b32.xlu1 %v1041_v58, %s2571_s10  ;;  %1074 = vrot.lane.b32.xlu0 %v1040_v59, %s2571_s10  ;;  %v1045_v32 = vmul.f32 %v1013_v26, %v903_v55  ;;  %v1044_v51 = vmul.f32 %v1013_v26, %v899_v56  ;;  %v1025_v49 = vrot.slane %v995_v24, %v2756_v31 }
 0x1e6   : > { %v1049_v53 = vmul.f32 %v1021_v23, %v925_v27  ;;  %v1048_v54 = vmul.f32 %v1021_v23, %v921_v50  ;;  %v997_v58 = vcombine.high %v993_v16, %v993_v16  ;;  %v947_v56 = vpop.permute.xlu1 %946  ;;  %v2966_v26 = vadd.f32 %v2895_v62, %v2952_v17 }
 0x1e7   : > { %v1051_v59 = vmul.f32 %v1025_v49, %v936_v18  ;;  %v1050_v7 = vmul.f32 %v1025_v49, %v932_v52  ;;  %v943_v57 = vpop.permute.xlu0 %942  ;;  %v2970_v48 = vadd.f32 %v2897_v63, %v2952_v17  ;;  %v2978_v62 = vadd.f32 %v2899_v0, %v2952_v17 }
 0x1e8   : > { %v1029_v55 = vrot.slane %v997_v58, %v2756_v31  ;;  %v2982_v63 = vadd.f32 %v2901_v1, %v2952_v17  ;;  %v2992_v1 = vadd.f32 %v2907_v4, %v2952_v17 }
 0x1e9   : > { %1080 = vrot.lane.b32.xlu1 %v1043_v20, %s2571_s10  ;;  %1078 = vrot.lane.b32.xlu0 %v1042_v21, %s2571_s10  ;;  %v2956_v20 = vadd.f32 %v2891_v60, %v2952_v17  ;;  %v2960_v21 = vadd.f32 %v2893_v61, %v2952_v17 }
 0x1ea   : > { %v1053_v8 = vmul.f32 %v1029_v55, %v947_v56  ;;  %v1052_v13 = vmul.f32 %v1029_v55, %v943_v57 }
 0x1eb   : > { %v2948_v11 = vpop.permute.xlu0 %1155 }
 0x1ed   : > { %1088 = vrot.lane.b32.xlu1 %v1047_v10, %s2571_s10  ;;  %1086 = vrot.lane.b32.xlu0 %v1046_v25, %s2571_s10 }
 0x1f1   : > { %1084 = vrot.lane.b32.xlu1 %v1045_v32, %s2571_s10  ;;  %1082 = vrot.lane.b32.xlu0 %v1044_v51, %s2571_s10 }
 0x1f5   : > { %1092 = vrot.lane.b32.xlu1 %v1049_v53, %s2571_s10  ;;  %1090 = vrot.lane.b32.xlu0 %v1048_v54, %s2571_s10 }
 0x1f9   : > { %1094 = vrot.lane.b32.xlu1 %v1050_v7, %s2571_s10  ;;  %1096 = vrot.lane.b32.xlu0 %v1051_v59, %s2571_s10  ;;  %v2996_v7 = vadd.f32 %v2909_v5, %v2952_v17  ;;  %v3006_v5 = vadd.f32 %v2903_v2, %v2952_v17 }
 0x1fd   : > { %1100 = vrot.lane.b32.xlu0 %v1053_v8, %s2571_s10  ;;  %1098 = vrot.lane.b32.xlu1 %v1052_v13, %s2571_s10  ;;  %s2186_s10 = sshll.u32 %s323_s26, 3 }
 0x1fe   : > { %s325_s21 = scalar_lea.vmem [#allocation2], %s2186_s10 }
 0x1ff   : > { %s2099_s12 = sshll.u32 %s325_s21, 4  ;;  %s2100_s12 = int_to_ptr.vmem [resolvable:$true] %s2099_s12 }
 0x200   : > { %s2507_s22 = scalar_lea.vmem %s2100_s12, 128  ;;  %p2514_p1 = scmp.lt.s32.totalorder %s2100_s12, %s2512_s24 }
 0x201   : > { %p2508_p12 = scmp.ne.s32.totalorder %s2100_s12, %s2507_s22 }
 0x203   : > { %p2509_p13 = pnand %p2508_p12, %p2659_p5 }
 0x205   : > { %p2510_p0 = pneg %p2509_p13 }
 0x253   : > { %v1073_v22 = vpop.permute.xlu1 %1072  ;;  %v1071_v16 = vpop.permute.xlu0 %1070 }
 0x254   : > { %v1119_v10 = vadd.f32 %v1073_v22, %v2956_v20  ;;  %v1118_v25 = vadd.f32 %v1071_v16, %v2960_v21 }
 0x256   : > { %v1135_v60 = vmax.f32 %v1119_v10, 0.0  ;;  %v1134_v27 = vmax.f32 %v1118_v25, 0.0  ;;  %v3010_v10 = vadd.f32 %v2905_v3, %v2952_v17  ;;  %v3020_v3 = vadd.f32 %v2911_v6, %v2952_v17 }
 0x257   : > { %v1077_v50 = vpop.permute.xlu1 %1076  ;;  %v1075_v23 = vpop.permute.xlu0 %1074 }
 0x258   : > { %v1159_v61 = vmul.f32 %v2948_v11, %v1135_v60  ;;  %v1121_v24 = vadd.f32 %v1077_v50, %v2966_v26  ;;  %v1120_v32 = vadd.f32 %v1075_v23, %v2970_v48  ;;  %v1158_v51 = vmul.f32 %v2948_v11, %v1134_v27 }
 0x25a   : > { %v1137_v18 = vmax.f32 %v1121_v24, 0.0  ;;  %v1136_v52 = vmax.f32 %v1120_v32, 0.0  ;;  %1192 = vrot.lane.b32.xlu0 %v1159_v61, %s2573_s20  ;;  %1190 = vrot.lane.b32.xlu1 %v1158_v51, %s2573_s20  ;;  %v3024_v32 = vadd.f32 %v2913_v9, %v2952_v17  ;;  %v3034_v9 = vadd.f32 %v2915_v12, %v2952_v17 }
 0x25b   : > { %v1081_v53 = vpop.permute.xlu1 %1080  ;;  %v1079_v54 = vpop.permute.xlu0 %1078 }
 0x25c   : > { %v1161_v49 = vmul.f32 %v2948_v11, %v1137_v18  ;;  %v1123_v58 = vadd.f32 %v1081_v53, %v2978_v62  ;;  %v1122_v0 = vadd.f32 %v1079_v54, %v2982_v63  ;;  %v1160_v59 = vmul.f32 %v2948_v11, %v1136_v52 }
 0x25e   : > { %v1139_v55 = vmax.f32 %v1123_v58, 0.0  ;;  %v1138_v56 = vmax.f32 %v1122_v0, 0.0  ;;  %1196 = vrot.lane.b32.xlu0 %v1161_v49, %s2573_s20  ;;  %1194 = vrot.lane.b32.xlu1 %v1160_v59, %s2573_s20  ;;  %v3038_v0 = vadd.f32 %v2917_v14, %v2952_v17  ;;  %v3048_v14 = vadd.f32 %v2919_v15, %v2952_v17 }
 0x25f   : > { %v1089_v57 = vpop.permute.xlu1 %1088  ;;  %v1087_v8 = vpop.permute.xlu0 %1086 }
 0x260   : > { %v1163_v13 = vmul.f32 %v2948_v11, %v1139_v55  ;;  %v1127_v22 = vadd.f32 %v1089_v57, %v2992_v1  ;;  %v1126_v16 = vadd.f32 %v1087_v8, %v2996_v7  ;;  %v1162_v4 = vmul.f32 %v2948_v11, %v1138_v56  ;;  %3435 = vst [vmem:[#allocation5_spill] sm:$0xff] %v3048_v14 }
 0x262   : > { %v1143_v25 = vmax.f32 %v1127_v22, 0.0  ;;  %v1142_v60 = vmax.f32 %v1126_v16, 0.0  ;;  %1200 = vrot.lane.b32.xlu0 %v1163_v13, %s2573_s20  ;;  %1198 = vrot.lane.b32.xlu1 %v1162_v4, %s2573_s20  ;;  %v3052_v16 = vadd.f32 %v2922_v19, %v2952_v17 }
 0x263   : > { %v1085_v27 = vpop.permute.xlu1 %1084  ;;  %v1083_v50 = vpop.permute.xlu0 %1082 }
 0x264   : > { %v1167_v23 = vmul.f32 %v2948_v11, %v1143_v25  ;;  %v1125_v61 = vadd.f32 %v1085_v27, %v3006_v5  ;;  %v1124_v24 = vadd.f32 %v1083_v50, %v3010_v10  ;;  %v1166_v2 = vmul.f32 %v2948_v11, %v1142_v60 }
 0x266   : > { %v1141_v51 = vmax.f32 %v1125_v61, 0.0  ;;  %v1140_v18 = vmax.f32 %v1124_v24, 0.0  ;;  %1208 = vrot.lane.b32.xlu0 %v1167_v23, %s2573_s20  ;;  %1206 = vrot.lane.b32.xlu1 %v1166_v2, %s2573_s20 }
 0x267   : > { %v1093_v52 = vpop.permute.xlu1 %1092  ;;  %v1091_v53 = vpop.permute.xlu0 %1090 }
 0x268   : > { %v1165_v54 = vmul.f32 %v2948_v11, %v1141_v51  ;;  %v1129_v49 = vadd.f32 %v1093_v52, %v3020_v3  ;;  %v1128_v58 = vadd.f32 %v1091_v53, %v3024_v32  ;;  %v1164_v6 = vmul.f32 %v2948_v11, %v1140_v18 }
 0x26a   : > { %v1145_v59 = vmax.f32 %v1129_v49, 0.0  ;;  %v1144_v55 = vmax.f32 %v1128_v58, 0.0  ;;  %1204 = vrot.lane.b32.xlu0 %v1165_v54, %s2573_s20  ;;  %1202 = vrot.lane.b32.xlu1 %v1164_v6, %s2573_s20 }
 0x26b   : > { %v1095_v56 = vpop.permute.xlu1 %1094  ;;  %v1097_v57 = vpop.permute.xlu0 %1096 }
 0x26c   : > { %v1169_v8 = vmul.f32 %v2948_v11, %v1145_v59  ;;  %v1168_v13 = vmul.f32 %v2948_v11, %v1144_v55  ;;  %v1130_v22 = vadd.f32 %v1095_v56, %v3038_v0  ;;  %v1131_v12 = vadd.f32 %v1097_v57, %v3034_v9 }
 0x26e   : > { %v1146_v4 = vmax.f32 %v1130_v22, 0.0  ;;  %v1147_v25 = vmax.f32 %v1131_v12, 0.0  ;;  %1212 = vrot.lane.b32.xlu0 %v1169_v8, %s2573_s20  ;;  %1210 = vrot.lane.b32.xlu1 %v1168_v13, %s2573_s20 }
 0x26f   : > { %v1101_v60 = vpop.permute.xlu0 %1100  ;;  %v1099_v27 = vpop.permute.xlu1 %1098 }
 0x270   : > { %v1170_v50 = vmul.f32 %v2948_v11, %v1146_v4  ;;  %v1171_v23 = vmul.f32 %v2948_v11, %v1147_v25  ;;  %v1133_v61 = vadd.f32 %v1101_v60, %v3048_v14  ;;  %v1132_v15 = vadd.f32 %v1099_v27, %v3052_v16 }
 0x272   : > { %v1149_v24 = vmax.f32 %v1133_v61, 0.0  ;;  %v1148_v2 = vmax.f32 %v1132_v15, 0.0  ;;  %1216 = vrot.lane.b32.xlu0 %v1171_v23, %s2573_s20  ;;  %1214 = vrot.lane.b32.xlu1 %v1170_v50, %s2573_s20 }
 0x274   : > { %v1173_v19 = vmul.f32 %v2948_v11, %v1149_v24  ;;  %v1172_v17 = vmul.f32 %v2948_v11, %v1148_v2 }
 0x276   : > { %1220 = vrot.lane.b32.xlu0 %v1173_v19, %s2573_s20  ;;  %1218 = vrot.lane.b32.xlu1 %v1172_v17, %s2573_s20  ;;  %s2226_s20 = sshll.u32 %s2642_s9, 7  ;;  %s2513_s9 = scalar_lea.vmem %s2512_s24, 256 }
 0x277   : > { %s3386_s18 = scalar_lea.hbm %s3429_s8, %s2226_s20  ;;  %p2515_p2 = scmp.lt.s32.totalorder %s2513_s9, %s2507_s22 }
 0x279   : > { %p2516_p3 = por %p2515_p2, %p2514_p1 }
 0x27b   : > { %p2517_p4 = pnand %p2516_p3, %p2510_p0 }
 0x2cc   : > { %v1193_v51 = vpop.permute.xlu0 %1192  ;;  %v1191_v18 = vpop.permute.xlu1 %1190 }
 0x2cd   : > { %v1241_v52 = vsel %vm588_vm2, %v1193_v51, 0.0  ;;  %v1238_v53 = vsel %vm588_vm2, %v1191_v18, 0.0 }
 0x2ce   : > { %1242 = vadd.xlane.f32.xlu0 %v1241_v52  ;;  %1239 = vadd.xlane.f32.xlu1 %v1238_v53 }
 0x2d0   : > { %v1197_v54 = vpop.permute.xlu0 %1196  ;;  %v1195_v49 = vpop.permute.xlu1 %1194 }
 0x2d1   : > { %v1247_v58 = vsel %vm588_vm2, %v1197_v54, 0.0  ;;  %v1244_v6 = vsel %vm588_vm2, %v1195_v49, 0.0 }
 0x2d2   : > { %1248 = vadd.xlane.f32.xlu1 %v1247_v58  ;;  %1245 = vadd.xlane.f32.xlu0 %v1244_v6 }
 0x2d4   : > { %v1201_v11 = vpop.permute.xlu0 %1200  ;;  %v1199_v59 = vpop.permute.xlu1 %1198 }
 0x2d5   : > { %v1253_v55 = vsel %vm588_vm2, %v1201_v11, 0.0  ;;  %v1250_v56 = vsel %vm588_vm2, %v1199_v59, 0.0 }
 0x2d6   : > { %1254 = vadd.xlane.f32.xlu1 %v1253_v55  ;;  %1251 = vadd.xlane.f32.xlu0 %v1250_v56 }
 0x2d8   : > { %v1209_v57 = vpop.permute.xlu0 %1208  ;;  %v1207_v8 = vpop.permute.xlu1 %1206 }
 0x2d9   : > { %v1265_v13 = vsel %vm588_vm2, %v1209_v57, 0.0  ;;  %v1262_v22 = vsel %vm588_vm2, %v1207_v8, 0.0 }
 0x2da   : > { %1266 = vadd.xlane.f32.xlu1 %v1265_v13  ;;  %1263 = vadd.xlane.f32.xlu0 %v1262_v22 }
 0x2dc   : > { %v1205_v12 = vpop.permute.xlu0 %1204  ;;  %v1203_v4 = vpop.permute.xlu1 %1202 }
 0x2dd   : > { %v1259_v25 = vsel %vm588_vm2, %v1205_v12, 0.0  ;;  %v1256_v60 = vsel %vm588_vm2, %v1203_v4, 0.0 }
 0x2de   : > { %1260 = vadd.xlane.f32.xlu1 %v1259_v25  ;;  %1257 = vadd.xlane.f32.xlu0 %v1256_v60 }
 0x2e0   : > { %v1213_v27 = vpop.permute.xlu0 %1212  ;;  %v1211_v50 = vpop.permute.xlu1 %1210 }
 0x2e1   : > { %v1271_v23 = vsel %vm588_vm2, %v1213_v27, 0.0  ;;  %v1268_v61 = vsel %vm588_vm2, %v1211_v50, 0.0 }
 0x2e2   : > { %1272 = vadd.xlane.f32.xlu1 %v1271_v23  ;;  %1269 = vadd.xlane.f32.xlu0 %v1268_v61 }
 0x2e4   : > { %v1217_v15 = vpop.permute.xlu0 %1216  ;;  %v1215_v24 = vpop.permute.xlu1 %1214 }
 0x2e5   : > { %v1277_v2 = vsel %vm588_vm2, %v1217_v15, 0.0  ;;  %v1274_v19 = vsel %vm588_vm2, %v1215_v24, 0.0 }
 0x2e6   : > { %1278 = vadd.xlane.f32.xlu1 %v1277_v2  ;;  %1275 = vadd.xlane.f32.xlu0 %v1274_v19 }
 0x2e8   : > { %v1221_v17 = vpop.permute.xlu0 %1220  ;;  %v1219_v51 = vpop.permute.xlu1 %1218 }
 0x2e9   : > { %v1283_v18 = vsel %vm588_vm2, %v1221_v17, 0.0  ;;  %v1280_v52 = vsel %vm588_vm2, %v1219_v51, 0.0 }
 0x2ea   : > { %1284 = vadd.xlane.f32.xlu1 %v1283_v18  ;;  %1281 = vadd.xlane.f32.xlu0 %v1280_v52 }
 0x2fb   : > { %1492 = vbcast.lane.b32.xlu1 %v2767_v34, 256 }
 0x2ff   : > { %1503 = vbcast.lane.b32.xlu1 %v2770_v35, 256 }
 0x300   : > { %1496 = vbcast.lane.b32.xlu0 %v2767_v34, 264 }
 0x303   : > { %1507 = vbcast.lane.b32.xlu1 %v2770_v35, 264 }
 0x304   : > { %1514 = vbcast.lane.b32.xlu0 %v2779_v37, 256 }
 0x307   : > { %1518 = vbcast.lane.b32.xlu1 %v2779_v37, 264 }
 0x308   : > { %1525 = vbcast.lane.b32.xlu0 %v2787_v39, 256 }
 0x30b   : > { %1529 = vbcast.lane.b32.xlu1 %v2787_v39, 264  ;;  %v1303_v39 = vand.u32 127, %v366_v29 }
 0x30c   : > { %1536 = vbcast.lane.b32.xlu0 %v2795_v41, 256 }
 0x30d   : > { %v3116_v59 = vsub.s32 %v1303_v39, %v2747_v30 }
 0x30f   : > { %1540 = vbcast.lane.b32.xlu1 %v2795_v41, 264  ;;  %v1308_v41 = vadd.s32 4294967288, %v1303_v39 }
 0x311   : > { %v3113_v11 = vsub.s32 %v1308_v41, %v2747_v30 }
 0x313   : > { %1551 = vbcast.lane.b32.xlu1 %v2803_v43, 264 }
 0x317   : > { %1562 = vbcast.lane.b32.xlu1 %v2811_v45, 264 }
 0x31b   : > { %1573 = vbcast.lane.b32.xlu1 %v2819_v47, 264 }
 0x357   : > { %v3095_v34 = vpop.xlane.xlu0 %1242  ;;  %v3097_v35 = vpop.xlane.xlu1 %1239 }
 0x358   : > { %v1312_v30 = vrot.slane %v3095_v34, %v3113_v11  ;;  %v1307_v22 = vrot.slane %v3097_v35, %v3116_v59 }
 0x35a   : > { %v1314_v23 = vsel %vm1313_vm3, %v1312_v30, %v1307_v22 }
 0x35b   : > { %v3099_v53 = vpop.xlane.xlu0 %1245  ;;  %v3101_v37 = vpop.xlane.xlu1 %1248 }
 0x35c   : > { %v1318_v29 = vrot.slane %v3099_v53, %v3116_v59  ;;  %v1322_v57 = vrot.slane %v3101_v37, %v3113_v11 }
 0x35e   : > { %v1323_v27 = vsel %vm1313_vm3, %v1322_v57, %v1318_v29 }
 0x35f   : > { %v3104_v54 = vpop.xlane.xlu0 %1251  ;;  %v3106_v49 = vpop.xlane.xlu1 %1254  ;;  %v1379_v2 = vsel %vm1378_vm4, %v1323_v27, %v1314_v23 }
 0x360   : > { %v1327_v8 = vrot.slane %v3104_v54, %v3116_v59  ;;  %v1331_v13 = vrot.slane %v3106_v49, %v3113_v11 }
 0x362   : > { %v1332_v50 = vsel %vm1313_vm3, %v1331_v13, %v1327_v8 }
 0x363   : > { %v3108_v58 = vpop.xlane.xlu0 %1263  ;;  %v3110_v6 = vpop.xlane.xlu1 %1266  ;;  %v1381_v52 = vsel %vm1380_vm5, %v1332_v50, %v1379_v2  ;;  %v2574_v2 = vmov 0  }
 0x364   : > { %v1345_v19 = vrot.slane %v3108_v58, %v3116_v59  ;;  %v1349_v17 = vrot.slane %v3110_v6, %v3113_v11  ;;  %2423 = vset.pattern.permute.xlu1 %v2574_v2  ;;  %2422 = vset.pattern.permute.xlu0 %v2574_v2 }
 0x366   : > { %v1350_v8 = vsel %vm1313_vm3, %v1349_v17, %v1345_v19 }
 0x367   : > { %v3118_v55 = vpop.xlane.xlu0 %1257  ;;  %v3120_v56 = vpop.xlane.xlu1 %1260 }
 0x368   : > { %v1336_v12 = vrot.slane %v3118_v55, %v3116_v59  ;;  %v1340_v4 = vrot.slane %v3120_v56, %v3113_v11 }
 0x36a   : > { %v1341_v61 = vsel %vm1313_vm3, %v1340_v4, %v1336_v12 }
 0x36b   : > { %v3138_v25 = vpop.xlane.xlu0 %1269  ;;  %v3140_v60 = vpop.xlane.xlu1 %1272  ;;  %v1383_v29 = vsel %vm1382_vm6, %v1341_v61, %v1381_v52 }
 0x36c   : > { %v1354_v15 = vrot.slane %v3138_v25, %v3116_v59  ;;  %v1358_v24 = vrot.slane %v3140_v60, %v3113_v11  ;;  %v1385_v27 = vsel %vm1384_vm7, %v1350_v8, %v1383_v29 }
 0x36e   : > { %v1359_v57 = vsel %vm1313_vm3, %v1358_v24, %v1354_v15 }
 0x36f   : > { %v3155_v51 = vpop.xlane.xlu0 %1275  ;;  %v3157_v18 = vpop.xlane.xlu1 %1278  ;;  %v1387_v50 = vsel %vm1386_vm8, %v1359_v57, %v1385_v27 }
 0x370   : > { %v1363_v39 = vrot.slane %v3155_v51, %v3116_v59  ;;  %v1367_v41 = vrot.slane %v3157_v18, %v3113_v11 }
 0x372   : > { %v1368_v22 = vsel %vm1313_vm3, %v1367_v41, %v1363_v39 }
 0x373   : > { %v3167_v13 = vpop.xlane.xlu0 %1281  ;;  %v3169_v30 = vpop.xlane.xlu1 %1284  ;;  %v1389_v61 = vsel %vm1388_vm9, %v1368_v22, %v1387_v50 }
 0x374   : > { %v1372_v12 = vrot.slane %v3167_v13, %v3116_v59  ;;  %v1376_v4 = vrot.slane %v3169_v30, %v3113_v11 }
 0x376   : > { %v1377_v23 = vsel %vm1313_vm3, %v1376_v4, %v1372_v12 }
 0x377   : > { %v1391_v15 = vsel %vm1390_vm10, %v1377_v23, %v1389_v61  ;;  %v1497_v19 = vpop.permute.xlu0 %1496 }
 0x378   : > { %v1394_v24 = vsel %vm1393_vm11, %v1391_v15, -inf }
 0x379   : > { %1395 = vmax.xlane.f32.xlu0 %v1394_v24 }
 0x37b   : > { %v3185_v17 = vpop.permute.xlu0 %1514 }
 0x37f   : > { %v3187_v52 = vpop.permute.xlu0 %1525 }
 0x383   : > { %v3189_v39 = vpop.permute.xlu0 %1536 }
 0x38f   : > { %1547 = vbcast.lane.b32.xlu0 %v2803_v43, 256  ;;  %v1493_v43 = vpop.permute.xlu1 %1492 }
 0x393   : > { %1558 = vbcast.lane.b32.xlu0 %v2811_v45, 256  ;;  %v1504_v50 = vpop.permute.xlu1 %1503 }
 0x397   : > { %1569 = vbcast.lane.b32.xlu0 %v2819_v47, 256 }
 0x402   : > { %v1396_v41 = vpop.xlane.xlu0 %1395 }
 0x403   : > { %v1401_v29 = vrot.slane %v1396_v41, %v2756_v31  ;;  %v1405_v57 = vrot.slane %v1396_v41, %v2764_v33  ;;  %v1409_v8 = vrot.slane %v1396_v41, %v2774_v36  ;;  %v1413_v23 = vrot.slane %v1396_v41, %v2782_v38 }
 0x405   : > { %v1439_v45 = vsub.f32 %v3095_v34, %v1401_v29  ;;  %v1438_v47 = vsub.f32 %v3097_v35, %v1401_v29  ;;  %v1440_v22 = vsub.f32 %v3099_v53, %v1405_v57  ;;  %v1441_v12 = vsub.f32 %v3101_v37, %v1405_v57  ;;  %v1508_v57 = vpop.permute.xlu1 %1507 }
 0x406   : > { %v1442_v15 = vsub.f32 %v3104_v54, %v1409_v8  ;;  %v1443_v24 = vsub.f32 %v3106_v49, %v1409_v8  ;;  %v1417_v34 = vrot.slane %v1396_v41, %v2790_v40  ;;  %v1444_v53 = vsub.f32 %v3118_v55, %v1413_v23 }
 0x407   : > { %v1456_v4 = vmul.f32 1.442695, %v1439_v45  ;;  %v1454_v27 = vmul.f32 1.442695, %v1438_v47  ;;  %v1458_v61 = vmul.f32 1.442695, %v1440_v22  ;;  %v1445_v29 = vsub.f32 %v3120_v56, %v1413_v23 }
 0x408   : > { %v1460_v2 = vmul.f32 1.442695, %v1441_v12  ;;  %v1462_v35 = vmul.f32 1.442695, %v1442_v15  ;;  %v1464_v37 = vmul.f32 1.442695, %v1443_v24  ;;  %v1421_v45 = vrot.slane %v1396_v41, %v2798_v42 }
 0x409   : > { %2456 = vpow2.f32 %v1456_v4  ;;  %v1466_v54 = vmul.f32 1.442695, %v1444_v53  ;;  %v1446_v49 = vsub.f32 %v3108_v58, %v1417_v34  ;;  %v1468_v47 = vmul.f32 1.442695, %v1445_v29  ;;  %v1519_v22 = vpop.permute.xlu1 %1518 }
 0x40a   : > { %2458 = vpow2.f32 %v1454_v27  ;;  %v1447_v8 = vsub.f32 %v3110_v6, %v1417_v34  ;;  %v1448_v12 = vsub.f32 %v3138_v25, %v1421_v45  ;;  %v1425_v55 = vrot.slane %v1396_v41, %v2806_v44 }
 0x40b   : > { %2460 = vpow2.f32 %v1458_v61  ;;  %v1470_v4 = vmul.f32 1.442695, %v1446_v49  ;;  %v1449_v27 = vsub.f32 %v3140_v60, %v1421_v45  ;;  %v1429_v61 = vrot.slane %v1396_v41, %v2814_v46 }
 0x40c   : > { %2462 = vpow2.f32 %v1460_v2  ;;  %v1472_v56 = vmul.f32 1.442695, %v1447_v8  ;;  %v1474_v58 = vmul.f32 1.442695, %v1448_v12  ;;  %v1450_v24 = vsub.f32 %v3155_v51, %v1425_v55 }
 0x40d   : > { %2464 = vpow2.f32 %v1462_v35  ;;  %v1476_v25 = vmul.f32 1.442695, %v1449_v27  ;;  %v1451_v34 = vsub.f32 %v3157_v18, %v1425_v55  ;;  %v1452_v51 = vsub.f32 %v3167_v13, %v1429_v61 }
 0x40e   : > { %2466 = vpow2.f32 %v1464_v37  ;;  %v1530_v37 = vpop.permute.xlu1 %1529  ;;  %v1478_v60 = vmul.f32 1.442695, %v1450_v24  ;;  %v1453_v45 = vsub.f32 %v3169_v30, %v1429_v61 }
 0x40f   : > { %2468 = vpow2.f32 %v1466_v54  ;;  %v1480_v29 = vmul.f32 1.442695, %v1451_v34  ;;  %v1482_v49 = vmul.f32 1.442695, %v1452_v51 }
 0x410   : > { %2470 = vpow2.f32 %v1468_v47  ;;  %v1484_v8 = vmul.f32 1.442695, %v1453_v45 }
 0x411   : > { %2472 = vpow2.f32 %v1470_v4  ;;  %v1548_v4 = vpop.permute.xlu0 %1547 }
 0x412   : > { %2474 = vpow2.f32 %v1472_v56  ;;  %v1541_v54 = vpop.permute.xlu1 %1540 }
 0x413   : > { %2476 = vpow2.f32 %v1474_v58 }
 0x414   : > { %2478 = vpow2.f32 %v1476_v25 }
 0x415   : > { %2480 = vpow2.f32 %v1478_v60 }
 0x416   : > { %v2457_v23 = vpop.eup %2456  ;;  %2482 = vpow2.f32 %v1480_v29  ;;  %v1552_v56 = vpop.permute.xlu1 %1551 }
 0x417   : > { %v2459_v15 = vpop.eup %2458  ;;  %v3212_v2 = vmul.f32 %v2457_v23, %v1497_v19  ;;  %2484 = vpow2.f32 %v1482_v49 }
 0x418   : > { %v2461_v6 = vpop.eup %2460  ;;  %v3215_v35 = vmul.f32 %v2459_v15, %v1493_v43  ;;  %2486 = vpow2.f32 %v1484_v8 }
 0x419   : > { %v2463_v53 = vpop.eup %2462  ;;  %1627 = vperm.xlu1 %2423, %v3212_v2   ;;  %v3220_v19 = vmul.f32 %v2461_v6, %v1504_v50 }
 0x41a   : > { %1624 = vperm.xlu0 %2422, %v3215_v35   ;;  %v2465_v41 = vpop.eup %2464  ;;  %v3223_v18 = vmul.f32 %v2463_v53, %v1508_v57  ;;  %v1563_v58 = vpop.permute.xlu1 %1562 }
 0x41b   : > { %v2467_v43 = vpop.eup %2466  ;;  %v3228_v47 = vmul.f32 %v2465_v41, %v3185_v17 }
 0x41c   : > { %v2469_v13 = vpop.eup %2468  ;;  %v3230_v50 = vmul.f32 %v2467_v43, %v1519_v22 }
 0x41d   : > { %1630 = vperm.xlu1 %2423, %v3220_v19   ;;  %v2471_v12 = vpop.eup %2470  ;;  %v3235_v30 = vmul.f32 %v2469_v13, %v3187_v52  ;;  %v1559_v52 = vpop.permute.xlu0 %1558 }
 0x41e   : > { %1633 = vperm.xlu0 %2422, %v3223_v18   ;;  %v2473_v57 = vpop.eup %2472  ;;  %v3237_v55 = vmul.f32 %v2471_v12, %v1530_v37  ;;  %v1574_v51 = vpop.permute.xlu1 %1573 }
 0x41f   : > { %v2475_v17 = vpop.eup %2474  ;;  %v3242_v22 = vmul.f32 %v2473_v57, %v3189_v39 }
 0x420   : > { %v2477_v27 = vpop.eup %2476  ;;  %v3244_v23 = vmul.f32 %v2475_v17, %v1541_v54 }
 0x421   : > { %1636 = vperm.xlu1 %2423, %v3228_v47   ;;  %v2479_v61 = vpop.eup %2478  ;;  %v3248_v15 = vmul.f32 %v2477_v27, %v1548_v4  ;;  %v1570_v37 = vpop.permute.xlu0 %1569 }
 0x422   : > { %1639 = vperm.xlu0 %2422, %v3230_v50   ;;  %v2481_v24 = vpop.eup %2480  ;;  %v3250_v6 = vmul.f32 %v2479_v61, %v1552_v56 }
 0x423   : > { %v2483_v25 = vpop.eup %2482  ;;  %v3254_v39 = vmul.f32 %v2481_v24, %v1559_v52 }
 0x424   : > { %v2485_v34 = vpop.eup %2484  ;;  %v3256_v53 = vmul.f32 %v2483_v25, %v1563_v58 }
 0x425   : > { %1642 = vperm.xlu1 %2423, %v3235_v30   ;;  %v2487_v60 = vpop.eup %2486  ;;  %v3260_v41 = vmul.f32 %v2485_v34, %v1570_v37 }
 0x426   : > { %1645 = vperm.xlu0 %2422, %v3237_v55   ;;  %v3262_v29 = vmul.f32 %v2487_v60, %v1574_v51 }
 0x429   : > { %1648 = vperm.xlu1 %2423, %v3242_v22  }
 0x42a   : > { %1651 = vperm.xlu0 %2422, %v3244_v23  }
 0x42d   : > { %1654 = vperm.xlu1 %2423, %v3248_v15  }
 0x42e   : > { %1657 = vperm.xlu0 %2422, %v3250_v6  }
 0x431   : > { %1660 = vperm.xlu1 %2423, %v3254_v39  }
 0x432   : > { %1663 = vperm.xlu0 %2422, %v3256_v53  }
 0x435   : > { %1666 = vperm.xlu1 %2423, %v3260_v41  }
 0x436   : > { %1669 = vperm.xlu0 %2422, %v3262_v29  }
 0x494   : > { %v1628_v45 = vpop.permute.xlu1 %1627 }
 0x495   : > { %v1625_v43 = vpop.permute.xlu0 %1624  ;;  %v1678_v34 = vrot.slane %v1628_v45, %v3113_v11 }
 0x496   : > { %v1674_v25 = vrot.slane %v1625_v43, %v3116_v59 }
 0x498   : > { %v1631_v54 = vpop.permute.xlu1 %1630 }
 0x499   : > { %v1634_v49 = vpop.permute.xlu0 %1633  ;;  %v1683_v27 = vrot.slane %v1631_v54, %v3116_v59 }
 0x49a   : > { %v1687_v56 = vrot.slane %v1634_v49, %v3113_v11 }
 0x49c   : > { %v1637_v13 = vpop.permute.xlu1 %1636  ;;  %v1688_v54 = vsel %vm1313_vm3, %v1687_v56, %v1683_v27 }
 0x49d   : > { %v1640_v8 = vpop.permute.xlu0 %1639  ;;  %v1692_v58 = vrot.slane %v1637_v13, %v3116_v59 }
 0x49e   : > { %v1696_v52 = vrot.slane %v1640_v8, %v3113_v11 }
 0x4a0   : > { %v1643_v12 = vpop.permute.xlu1 %1642  ;;  %v1697_v14 = vsel %vm1313_vm3, %v1696_v52, %v1692_v58 }
 0x4a1   : > { %v1646_v57 = vpop.permute.xlu0 %1645  ;;  %v1701_v60 = vrot.slane %v1643_v12, %v3116_v59 }
 0x4a2   : > { %v1705_v37 = vrot.slane %v1646_v57, %v3113_v11  ;;  %v1679_v57 = vsel %vm1313_vm3, %v1678_v34, %v1674_v25 }
 0x4a4   : > { %v1649_v4 = vpop.permute.xlu1 %1648  ;;  %v1706_v12 = vsel %vm1313_vm3, %v1705_v37, %v1701_v60 }
 0x4a5   : > { %v1652_v17 = vpop.permute.xlu0 %1651  ;;  %v1710_v49 = vrot.slane %v1649_v4, %v3116_v59  ;;  %v1743_v4 = vsel %vm1378_vm4, %v1688_v54, %v1679_v57 }
 0x4a6   : > { %v1714_v51 = vrot.slane %v1652_v17, %v3113_v11  ;;  %v1744_v27 = vsel %vm1380_vm5, %v1697_v14, %v1743_v4 }
 0x4a7   : > { %v1745_v52 = vsel %vm1382_vm6, %v1706_v12, %v1744_v27 }
 0x4a8   : > { %v1655_v61 = vpop.permute.xlu1 %1654  ;;  %v1715_v56 = vsel %vm1313_vm3, %v1714_v51, %v1710_v49 }
 0x4a9   : > { %v1658_v24 = vpop.permute.xlu0 %1657  ;;  %v1719_v8 = vrot.slane %v1655_v61, %v3116_v59  ;;  %v1746_v34 = vsel %vm1384_vm7, %v1715_v56, %v1745_v52 }
 0x4aa   : > { %v1723_v28 = vrot.slane %v1658_v24, %v3113_v11 }
 0x4ac   : > { %v1661_v13 = vpop.permute.xlu1 %1660  ;;  %v1724_v61 = vsel %vm1313_vm3, %v1723_v28, %v1719_v8 }
 0x4ad   : > { %v1664_v43 = vpop.permute.xlu0 %1663  ;;  %v1728_v45 = vrot.slane %v1661_v13, %v3116_v59  ;;  %v1747_v60 = vsel %vm1386_vm8, %v1724_v61, %v1746_v34 }
 0x4ae   : > { %v1732_v17 = vrot.slane %v1664_v43, %v3113_v11 }
 0x4b0   : > { %v1667_v24 = vpop.permute.xlu1 %1666  ;;  %v1733_v58 = vsel %vm1313_vm3, %v1732_v17, %v1728_v45 }
 0x4b1   : > { %v1670_v13 = vpop.permute.xlu0 %1669  ;;  %v1737_v25 = vrot.slane %v1667_v24, %v3116_v59  ;;  %v1748_v14 = vsel %vm1388_vm9, %v1733_v58, %v1747_v60 }
 0x4b2   : > { %v1741_v37 = vrot.slane %v1670_v13, %v3113_v11 }
 0x4b4   : > { %v1742_v51 = vsel %vm1313_vm3, %v1741_v37, %v1737_v25 }
 0x4b5   : > { %v1749_v28 = vsel %vm1390_vm10, %v1742_v51, %v1748_v14 }
 0x4b6   : > { %v1751_v49 = vsel %vm1393_vm11, %v1749_v28, 0.0 }
 0x4b7   : > { %1752 = vadd.xlane.f32.xlu1 %v1751_v49 }
 0x540   : > { %v1753_v54 = vpop.xlane.xlu1 %1752 }
 0x541   : > { %v1754_v8 = vadd.f32 1e-10, %v1753_v54 }
 0x543   : > { %v1775_v43 = vrot.slane %v1754_v8, %v2790_v40  ;;  %v1759_v59 = vrot.slane %v1754_v8, %v2756_v31  ;;  %v1787_v45 = vrot.slane %v1754_v8, %v2814_v46  ;;  %v1763_v11 = vrot.slane %v1754_v8, %v2764_v33 }
 0x544   : > { %v1767_v57 = vrot.slane %v1754_v8, %v2774_v36  ;;  %v1771_v46 = vrot.slane %v1754_v8, %v2782_v38  ;;  %v1779_v24 = vrot.slane %v1754_v8, %v2798_v42 }
 0x545   : > { %2488 = vrcp.f32 %v1775_v43 }
 0x546   : > { %2490 = vrcp.f32 %v1759_v59 }
 0x547   : > { %2492 = vrcp.f32 %v1787_v45 }
 0x548   : > { %2494 = vrcp.f32 %v1763_v11 }
 0x549   : > { %2496 = vrcp.f32 %v1767_v57 }
 0x54a   : > { %2498 = vrcp.f32 %v1771_v46 }
 0x54b   : > { %2500 = vrcp.f32 %v1779_v24 }
 0x552   : > { %v2489_v12 = vpop.eup %2488 }
 0x553   : > { %v2491_v17 = vpop.eup %2490  ;;  %v1810_v4 = vmul.f32 %v2489_v12, %v3244_v23 }
 0x554   : > { %v2493_v56 = vpop.eup %2492  ;;  %v1797_v27 = vmul.f32 %v2491_v17, %v3215_v35  ;;  %v1798_v40 = vmul.f32 %v2491_v17, %v3212_v2 }
 0x555   : > { %1867 = vperm.xlu1 %2423, %v1810_v4   ;;  %v1818_v31 = vmul.f32 %v2493_v56, %v3260_v41  ;;  %v2495_v33 = vpop.eup %2494 }
 0x556   : > { %1822 = vperm.xlu0 %2422, %v1797_v27   ;;  %v1800_v36 = vmul.f32 %v2495_v33, %v3220_v19  ;;  %v1801_v23 = vmul.f32 %v2495_v33, %v3223_v18  ;;  %v2497_v61 = vpop.eup %2496  ;;  %v1783_v19 = vrot.slane %v1754_v8, %v2806_v44  ;;  %v1809_v18 = vmul.f32 %v2489_v12, %v3242_v22  ;;  %v1991_v44 = vld [vmem:[%s3427_s6 + $0x18] sm:$0xff] }
 0x557   : > { %v1803_v35 = vmul.f32 %v2497_v61, %v3228_v47  ;;  %v1804_v2 = vmul.f32 %v2497_v61, %v3230_v50  ;;  %v2499_v41 = vpop.eup %2498  ;;  %2367 = vmatpush3.msra.mxu0 %v1991_v44  ;;  %v3436_v22 = vmov 0.0  }
 0x558   : > { %v1806_v52 = vmul.f32 %v2499_v41, %v3235_v30  ;;  %v1807_v58 = vmul.f32 %v2499_v41, %v3237_v55  ;;  %2502 = vrcp.f32 %v1783_v19  ;;  %v2501_v47 = vpop.eup %2500  ;;  %2368 = vmatprep.subr.mxu0 %v3436_v22 }
 0x559   : > { %1892 = vperm.xlu1 %2423, %v1818_v31   ;;  %v1812_v42 = vmul.f32 %v2501_v47, %v3248_v15  ;;  %v1813_v50 = vmul.f32 %v2501_v47, %v3250_v6  ;;  %v1819_v15 = vmul.f32 %v2493_v56, %v3262_v29  ;;  %v1990_v6 = vld [vmem:[%s3427_s6 + $0x10] sm:$0xff] }
 0x55a   : > { %1827 = vperm.xlu0 %2422, %v1798_v40   ;;  %2369 = vmatpush3.msra.mxu0 %v1990_v6 }
 0x55b   : > { %2370 = vmatprep.subr.mxu0 %v3436_v22 }
 0x55e   : > { %1832 = vperm.xlu0 %2422, %v1800_v36  }
 0x562   : > { %1837 = vperm.xlu0 %2422, %v1801_v23  }
 0x565   : > { %v2503_v13 = vpop.eup %2502 }
 0x566   : > { %1842 = vperm.xlu0 %2422, %v1803_v35   ;;  %v1815_v30 = vmul.f32 %v2503_v13, %v3254_v39  ;;  %v1816_v55 = vmul.f32 %v2503_v13, %v3256_v53  ;;  %v1989_v39 = vld [vmem:[%s3427_s6 + $0x8] sm:$0xff]  ;;  %v1988_v53 = vld [vmem:[%s3427_s6] sm:$0xff] }
 0x567   : > { %2371 = vmatpush3.msra.mxu0 %v1989_v39 }
 0x568   : > { %2372 = vmatprep.subr.mxu0 %v3436_v22 }
 0x569   : > { %2373 = vmatpush3.msra.mxu0 %v1988_v53 }
 0x56a   : > { %1847 = vperm.xlu0 %2422, %v1804_v2  }
 0x56e   : > { %1852 = vperm.xlu0 %2422, %v1806_v52  }
 0x572   : > { %1857 = vperm.xlu0 %2422, %v1807_v58  }
 0x576   : > { %1862 = vperm.xlu0 %2422, %v1809_v18  }
 0x57a   : > { %1872 = vperm.xlu0 %2422, %v1812_v42  }
 0x57e   : > { %1877 = vperm.xlu0 %2422, %v1813_v50  }
 0x582   : > { %1882 = vperm.xlu0 %2422, %v1815_v30  }
 0x586   : > { %1887 = vperm.xlu0 %2422, %v1816_v55  }
 0x58a   : > { %1897 = vperm.xlu0 %2422, %v1819_v15  }
 0x5d0   : > { %v1868_v8 = vpop.permute.xlu1 %1867 }
 0x5d1   : > { %v1823_v29 = vpop.permute.xlu0 %1822 }
 0x5d2   : > { %v1900_v12 = vmul.f32 %v1823_v29, %v2960_v21 }
 0x5d4   : > { %v1893_v15 = vpop.permute.xlu1 %1892 }
 0x5d5   : > { %v1828_v25 = vpop.permute.xlu0 %1827 }
 0x5d6   : > { %v1901_v43 = vmul.f32 %v1828_v25, %v2956_v20 }
 0x5d8   : > { %v1917_v20 = vsel %vm588_vm2, %v1901_v43, 0.0  ;;  %v3437_v43 = vld [vmem:[#allocation5_spill] sm:$0xff] }
 0x5d9   : > { %v1833_v34 = vpop.permute.xlu0 %1832 }
 0x5da   : > { %v1902_v59 = vmul.f32 %v1833_v34, %v2970_v48 }
 0x5dc   : > { %v1925_v48 = vsel %vm588_vm2, %v1902_v59, 0.0 }
 0x5dd   : > { %v1838_v37 = vpop.permute.xlu0 %1837 }
 0x5de   : > { %v1903_v49 = vmul.f32 %v1838_v37, %v2966_v26  ;;  %v1914_v37 = vmul.f32 %v1893_v15, %v3052_v16 }
 0x5e0   : > { %v1926_v17 = vsel %vm588_vm2, %v1903_v49, 0.0 }
 0x5e1   : > { %v1843_v60 = vpop.permute.xlu0 %1842 }
 0x5e2   : > { %v1904_v11 = vmul.f32 %v1843_v60, %v2982_v63  ;;  %v1927_v63 = vadd.f32 %v1926_v17, %v1925_v48 }
 0x5e4   : > { %v1934_v27 = vsel %vm588_vm2, %v1904_v11, 0.0  ;;  %v1928_v61 = vrot.slane %v1927_v63, 4 }
 0x5e5   : > { %v1848_v51 = vpop.permute.xlu0 %1847 }
 0x5e6   : > { %v1905_v54 = vmul.f32 %v1848_v51, %v2978_v62  ;;  %v1909_v62 = vmul.f32 %v1868_v8, %v2992_v1  ;;  %v1929_v47 = vadd.f32 %v1928_v61, %v1927_v63 }
 0x5e8   : > { %v1935_v56 = vsel %vm588_vm2, %v1905_v54, 0.0  ;;  %v1953_v1 = vsel %vm588_vm2, %v1909_v62, 0.0  ;;  %v1930_v6 = vrot.slane %v1929_v47, 2 }
 0x5e9   : > { %v1853_v14 = vpop.permute.xlu0 %1852  ;;  %v1936_v40 = vadd.f32 %v1935_v56, %v1934_v27 }
 0x5ea   : > { %v1906_v4 = vmul.f32 %v1853_v14, %v3010_v10  ;;  %v1916_v10 = vsel %vm588_vm2, %v1900_v12, 0.0 }
 0x5eb   : > { %v1918_v46 = vadd.f32 %v1917_v20, %v1916_v10  ;;  %v1937_v24 = vrot.slane %v1936_v40, 4 }
 0x5ed   : > { %v1858_v28 = vpop.permute.xlu0 %1857  ;;  %v1919_v41 = vrot.slane %v1918_v46, 4  ;;  %v1938_v13 = vadd.f32 %v1937_v24, %v1936_v40 }
 0x5ee   : > { %v1907_v45 = vmul.f32 %v1858_v28, %v3006_v5  ;;  %v1931_v28 = vadd.f32 %v1930_v6, %v1929_v47 }
 0x5ef   : > { %v1920_v30 = vadd.f32 %v1919_v41, %v1918_v46  ;;  %v1939_v53 = vrot.slane %v1938_v13, 2 }
 0x5f0   : > { %v1944_v5 = vsel %vm588_vm2, %v1907_v45, 0.0  ;;  %v1932_v17 = vrot.slane %v1931_v28, 1 }
 0x5f1   : > { %v1863_v57 = vpop.permute.xlu0 %1862  ;;  %v1921_v25 = vrot.slane %v1920_v30, 2  ;;  %v1940_v8 = vadd.f32 %v1939_v53, %v1938_v13  ;;  %v2506_v13 = vld [vmem:[%s3428_s7] sm:$0xff] }
 0x5f2   : > { %v1908_v26 = vmul.f32 %v1863_v57, %v2996_v7  ;;  %v1943_v7 = vsel %vm588_vm2, %v1906_v4, 0.0 }
 0x5f3   : > { %v1945_v33 = vadd.f32 %v1944_v5, %v1943_v7  ;;  %v1922_v45 = vadd.f32 %v1921_v25, %v1920_v30  ;;  %v1941_v56 = vrot.slane %v1940_v8, 1  ;;  %v1995_v30 = vrot.slane %v2506_v13, %v2782_v38 }
 0x5f4   : > { %v1952_v21 = vsel %vm588_vm2, %v1908_v26, 0.0 }
 0x5f5   : > { %v1873_v31 = vpop.permute.xlu0 %1872  ;;  %v1954_v36 = vadd.f32 %v1953_v1, %v1952_v21  ;;  %v1946_v52 = vrot.slane %v1945_v33, 4  ;;  %v1923_v20 = vrot.slane %v1922_v45, 1  ;;  %v1933_v21 = vadd.f32 %v1932_v17, %v1931_v28 }
 0x5f6   : > { %v1910_v23 = vmul.f32 %v1873_v31, %v3024_v32  ;;  %v1942_v7 = vadd.f32 %v1941_v56, %v1940_v8 }
 0x5f7   : > { %v1955_v19 = vrot.slane %v1954_v36, 4  ;;  %v1947_v44 = vadd.f32 %v1946_v52, %v1945_v33  ;;  %v1924_v1 = vadd.f32 %v1923_v20, %v1922_v45 }
 0x5f8   : > { %v1961_v58 = vsel %vm588_vm2, %v1910_v23, 0.0 }
 0x5f9   : > { %v1878_v35 = vpop.permute.xlu0 %1877  ;;  %v1956_v32 = vadd.f32 %v1955_v19, %v1954_v36  ;;  %v1948_v34 = vrot.slane %v1947_v44, 2  ;;  %v2004_v61 = vsel %vm1378_vm4, %v1933_v21, %v1924_v1 }
 0x5fa   : > { %v1911_v2 = vmul.f32 %v1878_v35, %v3020_v3 }
 0x5fb   : > { %v1957_v60 = vrot.slane %v1956_v32, 2  ;;  %v1949_v11 = vadd.f32 %v1948_v34, %v1947_v44 }
 0x5fc   : > { %v1962_v18 = vsel %vm588_vm2, %v1911_v2, 0.0  ;;  %v2005_v2 = vsel %vm1380_vm5, %v1942_v7, %v2004_v61 }
 0x5fd   : > { %v1963_v42 = vadd.f32 %v1962_v18, %v1961_v58  ;;  %v1883_v50 = vpop.permute.xlu0 %1882  ;;  %v1958_v12 = vadd.f32 %v1957_v60, %v1956_v32  ;;  %v1950_v48 = vrot.slane %v1949_v11, 1 }
 0x5fe   : > { %v1912_v22 = vmul.f32 %v1883_v50, %v3038_v0 }
 0x5ff   : > { %v1964_v55 = vrot.slane %v1963_v42, 4  ;;  %v1959_v27 = vrot.slane %v1958_v12, 1  ;;  %v1951_v46 = vadd.f32 %v1950_v48, %v1949_v11 }
 0x600   : > { %v1970_v51 = vsel %vm588_vm2, %v1912_v22, 0.0 }
 0x601   : > { %v1965_v3 = vadd.f32 %v1964_v55, %v1963_v42  ;;  %v1888_v39 = vpop.permute.xlu0 %1887  ;;  %v1960_v23 = vadd.f32 %v1959_v27, %v1958_v12  ;;  %v2006_v52 = vsel %vm1382_vm6, %v1951_v46, %v2005_v2 }
 0x602   : > { %v1913_v29 = vmul.f32 %v1888_v39, %v3034_v9  ;;  %v1979_v9 = vsel %vm588_vm2, %v1914_v37, 0.0 }
 0x603   : > { %v1966_v49 = vrot.slane %v1965_v3, 2  ;;  %v2007_v58 = vsel %vm1384_vm7, %v1960_v23, %v2006_v52 }
 0x604   : > { %v1971_v14 = vsel %vm588_vm2, %v1913_v29, 0.0 }
 0x605   : > { %v1972_v54 = vadd.f32 %v1971_v14, %v1970_v51  ;;  %v1898_v0 = vpop.permute.xlu0 %1897  ;;  %v1967_v4 = vadd.f32 %v1966_v49, %v1965_v3 }
 0x606   : > { %v1915_v59 = vmul.f32 %v1898_v0, %v3437_v43 }
 0x607   : > { %v1973_v57 = vrot.slane %v1972_v54, 4  ;;  %v1968_v31 = vrot.slane %v1967_v4, 1 }
 0x608   : > { %v1980_v16 = vsel %vm588_vm2, %v1915_v59, 0.0 }
 0x609   : > { %v1974_v26 = vadd.f32 %v1973_v57, %v1972_v54  ;;  %v1981_v62 = vadd.f32 %v1980_v16, %v1979_v9  ;;  %v1969_v35 = vadd.f32 %v1968_v31, %v1967_v4 }
 0x60b   : > { %v1975_v5 = vrot.slane %v1974_v26, 2  ;;  %v1982_v63 = vrot.slane %v1981_v62, 4  ;;  %v2008_v47 = vsel %vm1386_vm8, %v1969_v35, %v2007_v58 }
 0x60d   : > { %v1976_v10 = vadd.f32 %v1975_v5, %v1974_v26  ;;  %v1983_v40 = vadd.f32 %v1982_v63, %v1981_v62 }
 0x60f   : > { %v1977_v33 = vrot.slane %v1976_v10, 1  ;;  %v1984_v36 = vrot.slane %v1983_v40, 2 }
 0x611   : > { %v1985_v24 = vadd.f32 %v1984_v36, %v1983_v40  ;;  %v1978_v41 = vadd.f32 %v1977_v33, %v1976_v10 }
 0x613   : > { %v1986_v19 = vrot.slane %v1985_v24, 1  ;;  %v2009_v42 = vsel %vm1388_vm9, %v1978_v41, %v2008_v47 }
 0x615   : > { %v1987_v18 = vadd.f32 %v1986_v19, %v1985_v24 }
 0x617   : > { %v2010_v50 = vsel %vm1390_vm10, %v1987_v18, %v2009_v42 }
 0x618   : > { %2375 = vmatmul.mubr.msk.f32.vlgmr.msra.gmra.mxu0 %vm588_vm2, %v2010_v50 }
 0x6d8   : > { %v2079_v44 = vpop.f32.mrf.mxu0 }
 0x6d9   : > { %v2080_v55 = vadd.f32 %v2079_v44, %v1995_v30 }
 0x6da   : > { %v2376_v32 = vpop.f32.mrf.mxu0 }
 0x6db   : > { %2504 = vtanh.f32 %v2080_v55 }
 0x6e8   : > { %v2505_v22 = vpop.eup %2504 }
 0x6e9   : > { %2084 = vst [vmem:[%s325_s21] sm:$0xff] %v2505_v22 }
 0x6ea   : > { %2520 = shalt.err (!%p2517_p4)
}
 0x6eb   : > { %s2521_s25 = scalar_lea.hbm %s3386_s18, 128  ;;  %s2525_s20 = scalar_lea.hbm %s3429_s8, 256 }
 0x6ec   : > { %p2522_p7 = scmp.ne.s32.totalorder %s3386_s18, %s2521_s25  ;;  %p2526_p10 = scmp.lt.s32.totalorder %s3386_s18, %s3429_s8 }
 0x6ed   : > { %p2527_p11 = scmp.lt.s32.totalorder %s2525_s20, %s2521_s25 }
 0x6ee   : > { %p2523_p8 = pnand %p2522_p7, %p2659_p5 }
 0x6ef   : > { %p2528_p12 = por %p2527_p11, %p2526_p10 }
 0x6f0   : > { %p2524_p9 = pneg %p2523_p8 }
 0x6f2   : > { %p2529_p13 = pnand %p2528_p12, %p2524_p9 }
 0x6f4   : > { %2532 = shalt.err (!%p2529_p13)
}
 0x6f5   : > { %2377 = dma.vmem_to_hbm [thread:$0]  (%p2659_p5), %s2100_s12, 128, %s3386_s18, %s2086_s19  }
 0x6f6 PF: > { %p2383_p0 = scmp.ge.s32.totalorder %s2567_s30, 2  ;;  %s2111_s17 = sand.u32 1, %s2555_s27  }
 0x6f7   : > { %s2112_s22 = scalar_lea.sflag [#allocation3], %s2111_s17 }
 0x6f8   : > { %p2380_p1 = pnand %p2383_p0, %p2663_p6 }
 0x6fa   : > { %p2381_p2 = pneg %p2380_p1 }
 0x6fc   : > { %2550 = dma.done.wait (%p2381_p2), %s2112_s22, 128  }
 0x6fd   : > { %2552 = vsyncadd (%p2381_p2), %s2112_s22, 4294967168  ;;  %p18_p3 = scmp.ge.s32.totalorder %s2646_s11, 4   ;;  %s3438_s27 = smov %s2559_s28 }
 0x6fe   : > { %s3439_s28 = smov %s2563_s29  ;;  %s3440_s29 = smov %s2657_s14 }
 0x6ff   : > { %s3441_s30 = smov %s2646_s11  ;;  %20 = sbr.rel (!%p18_p3) target bundleno = 3 (0x3), region = 93 }
 0x704   :  { %2117 = vsyncpa [#allocation3], 1 }
 0x705   :  { %2119 = vsyncpa [#allocation3 + $0x1], 1 }

</bundles_post_ra>
